<compile_context>
chip_gen: v7x
topology: tpu7x:2x2x1
jax: 0.10.0
libtpu: 0.0.40
codegen_flags: <defaults>
</compile_context>

<pallas_src>
import jax
import jax.numpy as jnp
from jax.experimental import pallas as pl
from jax.experimental.pallas import tpu as pltpu


def _round_up(v, m):
    return ((v + m - 1) // m) * m


def _nearest_embed_kernel(xT_ref, embT_ref, emb_ref, esq_ref, qT_ref, idx_ref):
    # xT_ref:   (D, TN)   token tile, feature-major (tokens on the lane axis)
    # embT_ref: (Kp, D)   padded codebook, transposed (scores matmul)
    # emb_ref:  (D, Kp)   padded codebook (one-hot gather matmul)
    # esq_ref:  (Kp, 1)   per-codeword squared norms (padded columns = 1e30)
    # qT_ref:   (D, TN)   quantized tokens, feature-major
    # idx_ref:  (1, TN)   per-token argmin index (lane-dense int32)
    xT = xT_ref[...]                                              # (D, TN)
    kp = embT_ref.shape[0]
    tn = xT.shape[1]

    # scoresT[k, n] = <e_k, x_n>   (MXU, tokens on lanes, f32 accumulate)
    scoresT = jnp.dot(embT_ref[...], xT,
                      preferred_element_type=jnp.float32)         # (Kp, TN)

    # Squared L2 distance up to the token-constant ||x||^2 term (which does
    # not affect the argmin):  dist2[k, n] ~ ||e_k||^2 - 2 <x_n, e_k>
    dist2 = esq_ref[...] - 2.0 * scoresT                          # (Kp, TN)

    # First-occurrence argmin over K (sublane axis).
    minval = jnp.min(dist2, axis=0, keepdims=True)                # (1, TN)
    iota_k = jax.lax.broadcasted_iota(jnp.int32, (kp, tn), 0)     # (Kp, TN)
    idx = jnp.min(jnp.where(dist2 == minval, iota_k, kp),
                  axis=0, keepdims=True)                          # (1, TN)

    # Gather the selected codewords with a one-hot matmul (MXU).
    onehot = (iota_k == idx).astype(emb_ref.dtype)                # (Kp, TN)
    qT = jnp.dot(emb_ref[...], onehot,
                 preferred_element_type=jnp.float32)              # (D, TN)

    qT_ref[...] = qT.astype(qT_ref.dtype)
    idx_ref[...] = idx


def nearest_embed_pallas(x, emb, *, tile_n=512,
                         vmem_limit_bytes=48 * 1024 * 1024):
    """x: (B, D, *spatial) (PyTorch NCHW-style), emb: (D, K).

    Returns (quantized, argmin), matching NearestEmbedFunc.forward:
      quantized: (B, D, *spatial)   argmin: (B, *spatial) int32
    """
    B, D = x.shape[0], x.shape[1]
    spatial = x.shape[2:]
    K = emb.shape[1]
    assert emb.shape[0] == D, "input.size(1) must equal emb.size(0)"

    S = 1
    for s in spatial:
        S *= int(s)
    N = B * S

    # Feature-major token slab: xT[:, b*S + s] = x[b, :, s]  (one HBM transpose).
    xT = jnp.transpose(x.reshape(B, D, S), (1, 0, 2)).reshape(D, N)

    # Pad the codebook columns to a lane-width multiple. Padded codewords get a
    # huge squared norm so they can never win the argmin. Norms are hoisted
    # here (grid-invariant) instead of being recomputed per grid step.
    Kp = _round_up(max(K, 128), 128)
    emb_p = jnp.zeros((D, Kp), emb.dtype).at[:, :K].set(emb)
    embT_p = emb_p.T                                              # (Kp, D)
    emb_f32 = emb.astype(jnp.float32)
    e_sq = jnp.sum(emb_f32 * emb_f32, axis=0)                     # (K,)
    e_sq_p = jnp.full((Kp,), 1e30, jnp.float32).at[:K].set(e_sq).reshape(Kp, 1)

    # Pad the token axis to a tile multiple; the padding is sliced off below.
    tile_n = max(128, _round_up(tile_n, 128))
    tile_n = min(tile_n, _round_up(N, 128))
    N_pad = _round_up(N, tile_n)
    if N_pad != N:
        xT = jnp.pad(xT, ((0, 0), (0, N_pad - N)))
    grid = (N_pad // tile_n,)

    qT, idx = pl.pallas_call(
        _nearest_embed_kernel,
        out_shape=(
            jax.ShapeDtypeStruct((D, N_pad), x.dtype),
            jax.ShapeDtypeStruct((1, N_pad), jnp.int32),
        ),
        grid_spec=pltpu.PrefetchScalarGridSpec(
            num_scalar_prefetch=0,
            grid=grid,
            in_specs=[
                pl.BlockSpec((D, tile_n), lambda i: (0, i)),      # x^T tile
                pl.BlockSpec((Kp, D), lambda i: (0, 0)),          # codebook^T
                pl.BlockSpec((D, Kp), lambda i: (0, 0)),          # codebook
                pl.BlockSpec((Kp, 1), lambda i: (0, 0)),          # ||e_k||^2
            ],
            out_specs=[
                pl.BlockSpec((D, tile_n), lambda i: (0, i)),      # q^T tile
                pl.BlockSpec((1, tile_n), lambda i: (0, i)),      # argmin row
            ],
        ),
        compiler_params=pltpu.CompilerParams(
            dimension_semantics=("parallel",),
            vmem_limit_bytes=vmem_limit_bytes,
        ),
    )(xT, embT_p, emb_p, e_sq_p)

    qT = qT[:, :N]
    q = jnp.transpose(qT.reshape(D, B, S), (1, 0, 2)).reshape(B, D, *spatial)
    argmin = idx[0, :N].reshape(B, *spatial)
    return q, argmin


def _reference(x, emb):
    # Pure-JAX reference mirroring NearestEmbedFunc.forward.
    x_exp = x[..., None]                                          # (B, D, *S, 1)
    emb_exp = emb.reshape(emb.shape[0], *([1] * (x.ndim - 2)), emb.shape[1])
    dist = jnp.linalg.norm(x_exp - emb_exp, ord=2, axis=1)        # (B, *S, K)
    argmin = jnp.argmin(dist, axis=-1)                            # (B, *S)
    result = emb.T[argmin.reshape(-1)].reshape(
        x.shape[0], *x.shape[2:], x.shape[1])                     # (B, *S, D)
    return jnp.moveaxis(result, -1, 1), argmin                    # (B, D, *S)


if __name__ == "__main__":
    key = jax.random.PRNGKey(0)
    k_x, k_w = jax.random.split(key)

    B, D, H, W = 2, 4, 16, 16       # x: (batch, emb_dim, spatial...)
    num_emb = 16                    # K

    x = jax.random.normal(k_x, (B, D, H, W), dtype=jnp.float32)
    # nn.Parameter(torch.rand(embeddings_dim, num_embeddings)) -> uniform [0, 1)
    weight = jax.random.uniform(k_w, (D, num_emb), dtype=jnp.float32)

    q, idx = nearest_embed_pallas(x, weight)
    q = jax.block_until_ready(q)
    idx = jax.block_until_ready(idx)

    q_ref, idx_ref = _reference(x, weight)
    assert q.shape == (B, D, H, W) and idx.shape == (B, H, W)
    assert jnp.all(idx == idx_ref)
    assert jnp.allclose(q, q_ref, atol=1e-5, rtol=1e-5)

    # TODO(synk): backward (straight-through grad_input + codebook averaging)
    # is autograd machinery, not part of this forward kernel.
    print("KERNEL_OK")
</pallas_src>

<mosaic_0001>
module attributes {stable_mosaic.version = 11 : i64} {
  func.func @_nearest_embed_kernel(%arg0: i32, %arg1: memref<4x512xf32, #tpu.memory_space<vmem>>, %arg2: memref<128x4xf32, #tpu.memory_space<vmem>>, %arg3: memref<4x128xf32, #tpu.memory_space<vmem>>, %arg4: memref<128x1xf32, #tpu.memory_space<vmem>>, %arg5: memref<4x512xf32, #tpu.memory_space<vmem>>, %arg6: memref<1x512xi32, #tpu.memory_space<vmem>>) attributes {dimension_semantics = [#tpu.dimension_semantics<parallel>], iteration_bounds = array<i64: 1>, scalar_prefetch = 0 : i64, scratch_operands = 0 : i64, tpu.core_type = #tpu.core_type<tc>, window_params = [{transform_indices = @transform_0, window_bounds = array<i64: 4, 512>}, {pipeline_mode = #tpu.pipeline_mode<synchronous>, transform_indices = @transform_1, window_bounds = array<i64: 128, 4>}, {pipeline_mode = #tpu.pipeline_mode<synchronous>, transform_indices = @transform_2, window_bounds = array<i64: 4, 128>}, {pipeline_mode = #tpu.pipeline_mode<synchronous>, transform_indices = @transform_3, window_bounds = array<i64: 128, 1>}, {transform_indices = @transform_4, window_bounds = array<i64: 4, 512>}, {transform_indices = @transform_5, window_bounds = array<i64: 1, 512>}]} {
    %c0 = arith.constant 0 : index
    %c0_0 = arith.constant 0 : index
    %0 = vector.load %arg1[%c0, %c0_0] : memref<4x512xf32, #tpu.memory_space<vmem>>, vector<4x512xf32>
    %c0_1 = arith.constant 0 : index
    %c0_2 = arith.constant 0 : index
    %1 = vector.load %arg2[%c0_1, %c0_2] : memref<128x4xf32, #tpu.memory_space<vmem>>, vector<128x4xf32>
    %cst = arith.constant dense<0.000000e+00> : vector<128x512xf32>
    %2 = tpu.matmul %1, %0, %cst {dimension_numbers = #tpu.dot_dimension_numbers<[1], [0], [0], [1], [0, 0, 1, 1], [], []>} : vector<128x4xf32>, vector<4x512xf32>, vector<128x512xf32> -> vector<128x512xf32>
    %c0_3 = arith.constant 0 : index
    %c0_4 = arith.constant 0 : index
    %3 = vector.load %arg4[%c0_3, %c0_4] : memref<128x1xf32, #tpu.memory_space<vmem>>, vector<128x1xf32>
    %cst_5 = arith.constant 2.000000e+00 : f32
    %4 = vector.broadcast %cst_5 : f32 to vector<128x512xf32>
    %5 = arith.mulf %4, %2 : vector<128x512xf32>
    %6 = vector.broadcast %3 : vector<128x1xf32> to vector<128x512xf32>
    %7 = arith.subf %6, %5 : vector<128x512xf32>
    %cst_6 = arith.constant dense<0x7F800000> : vector<512xf32>
    %8 = vector.multi_reduction <minimumf>, %7, %cst_6 [0] : vector<128x512xf32> to vector<512xf32>
    %9 = vector.shape_cast %8 : vector<512xf32> to vector<1x512xf32>
    %10 = tpu.iota {dimensions = array<i32: 0>} : vector<128x512xi32>
    %11 = vector.broadcast %9 : vector<1x512xf32> to vector<128x512xf32>
    %12 = arith.cmpf oeq, %7, %11 : vector<128x512xf32>
    %c128_i32 = arith.constant 128 : i32
    %13 = vector.broadcast %c128_i32 : i32 to vector<128x512xi32>
    %14 = arith.select %12, %10, %13 : vector<128x512xi1>, vector<128x512xi32>
    %cst_7 = arith.constant dense<2147483647> : vector<512xi32>
    %15 = vector.multi_reduction <minsi>, %14, %cst_7 [0] : vector<128x512xi32> to vector<512xi32>
    %16 = vector.shape_cast %15 : vector<512xi32> to vector<1x512xi32>
    %17 = vector.broadcast %16 : vector<1x512xi32> to vector<128x512xi32>
    %18 = arith.cmpi eq, %10, %17 : vector<128x512xi32>
    %19 = arith.extui %18 : vector<128x512xi1> to vector<128x512xi32>
    %20 = arith.sitofp %19 : vector<128x512xi32> to vector<128x512xf32>
    %c0_8 = arith.constant 0 : index
    %c0_9 = arith.constant 0 : index
    %21 = vector.load %arg3[%c0_8, %c0_9] : memref<4x128xf32, #tpu.memory_space<vmem>>, vector<4x128xf32>
    %cst_10 = arith.constant dense<0.000000e+00> : vector<4x512xf32>
    %22 = tpu.matmul %21, %20, %cst_10 {dimension_numbers = #tpu.dot_dimension_numbers<[1], [0], [0], [1], [0, 0, 1, 1], [], []>} : vector<4x128xf32>, vector<128x512xf32>, vector<4x512xf32> -> vector<4x512xf32>
    %c0_11 = arith.constant 0 : index
    %c0_12 = arith.constant 0 : index
    %23 = vector.load %arg5[%c0_11, %c0_12] : memref<4x512xf32, #tpu.memory_space<vmem>>, vector<4x512xf32>
    tpu.vector_store %arg5[%c0_11, %c0_12], %22 {strides = array<i32>} : memref<4x512xf32, #tpu.memory_space<vmem>>, vector<4x512xf32>,
    %c0_13 = arith.constant 0 : index
    %c0_14 = arith.constant 0 : index
    %24 = vector.load %arg6[%c0_13, %c0_14] : memref<1x512xi32, #tpu.memory_space<vmem>>, vector<1x512xi32>
    tpu.vector_store %arg6[%c0_13, %c0_14], %16 {strides = array<i32>} : memref<1x512xi32, #tpu.memory_space<vmem>>, vector<1x512xi32>,
    return
  }
  func.func @transform_0(%arg0: i32) -> (i32, i32) {
    %c0_i32 = arith.constant 0 : i32
    %c0_i32_0 = arith.constant 0 : i32
    return %c0_i32, %arg0 : i32, i32
  }
  func.func @transform_1(%arg0: i32) -> (i32, i32) {
    %c0_i32 = arith.constant 0 : i32
    %c0_i32_0 = arith.constant 0 : i32
    %c0_i32_1 = arith.constant 0 : i32
    return %c0_i32, %c0_i32_0 : i32, i32
  }
  func.func @transform_2(%arg0: i32) -> (i32, i32) {
    %c0_i32 = arith.constant 0 : i32
    %c0_i32_0 = arith.constant 0 : i32
    %c0_i32_1 = arith.constant 0 : i32
    return %c0_i32, %c0_i32_0 : i32, i32
  }
  func.func @transform_3(%arg0: i32) -> (i32, i32) {
    %c0_i32 = arith.constant 0 : i32
    %c0_i32_0 = arith.constant 0 : i32
    %c0_i32_1 = arith.constant 0 : i32
    return %c0_i32, %c0_i32_0 : i32, i32
  }
  func.func @transform_4(%arg0: i32) -> (i32, i32) {
    %c0_i32 = arith.constant 0 : i32
    %c0_i32_0 = arith.constant 0 : i32
    return %c0_i32, %arg0 : i32, i32
  }
  func.func @transform_5(%arg0: i32) -> (i32, i32) {
    %c0_i32 = arith.constant 0 : i32
    %c0_i32_0 = arith.constant 0 : i32
    return %c0_i32, %arg0 : i32, i32
  }
}

</mosaic_0001>

<bundles_post_ra>
// kernel: tpu_custom_call.1
= control target key start
LH: loop header
LB: loop body
LE: loop exit
PB: predicated region body
PF: predicated region fallthrough
CT: control target
= control target key end

     0   :  { %11 = vsyncpa [#allocation3], 0  ;;  %vm92_vm0 = vcmask 1043456   ;;  %v1720_v4 = vmov 0.0   ;;  %vm43_vm1 = vcmask 31744   ;;  %v1721_v6 = vmov 0   ;;  %s2775_s0 = inlined_call_operand.vmem [shape: f32[4,512], index: 0, kind: input, shape index: {}]   ;;  %s2776_s1 = inlined_call_operand.vmem [shape: f32[128,4], index: 1, kind: input, shape index: {}]   ;;  %s2777_s2 = inlined_call_operand.vmem [shape: f32[4,128], index: 2, kind: input, shape index: {}]   ;;  %s2778_s3 = inlined_call_operand.vmem [shape: f32[128,1], index: 3, kind: input, shape index: {}]   ;;  %s2779_s4 = inlined_call_operand.hbm [shape: f32[4,512], index: 4, kind: output, shape index: {0}]   ;;  %s2780_s5 = inlined_call_operand.hbm [shape: s32[1,512], index: 5, kind: output, shape index: {1}]  }
   0x1   :  { %v21_v0 = vld [vmem:[%s2775_s0] sm:$0xff]  ;;  %v22_v1 = vld [vmem:[%s2775_s0 + $0x8] sm:$0xff]  ;;  %165 = vmatprep.mubr.f32.mxu0 %v1720_v4  ;;  %326 = vmatprep.mubr.f32.mxu1 %v1720_v4  ;;  %v425_v9 = vld [vmem:[%s2778_s3 + $0x10] sm:$0xff] }
   0x2   :  { %v41_v2 = vcombine.high %v21_v0, %v21_v0  ;;  %v42_v3 = vcombine.high %v22_v1, %v22_v1  ;;  %v23_v5 = vld [vmem:[%s2776_s1] sm:$0xff]  ;;  %1668 = vset.pattern.permute.xlu0 %v1721_v6  ;;  %1669 = vset.pattern.permute.xlu1 %v1721_v6  ;;  %v24_v7 = vld [vmem:[%s2776_s1 + $0x8] sm:$0xff]  ;;  %v426_v11 = vld [vmem:[%s2778_s3 + $0x18] sm:$0xff] }
   0x3   :  { %v423_v8 = vld [vmem:[%s2778_s3] sm:$0xff]  ;;  %515 = vperm.xlu1 %1669, %v425_v9   ;;  %v424_v10 = vld [vmem:[%s2778_s3 + $0x8] sm:$0xff]  ;;  %v25_v12 = vld [vmem:[%s2776_s1 + $0x10] sm:$0xff] }
   0x4   :  { %1434 = vmatprep.subr.msk.mxu0 %vm92_vm0, %v41_v2  ;;  %1452 = vmatprep.subr.msk.mxu1 %vm92_vm0, %v42_v3 }
   0x5   :  { %1435 = vmatpush1.msk.msra.mxu0 %vm92_vm0, %v21_v0  ;;  %1453 = vmatpush1.msk.msra.mxu1 %vm92_vm0, %v22_v1 }
   0x6   :  { %1436 = vmatmul.mubr.msk.f32.vlgmr.msra.gmra.mrb[0].mxu0 %vm43_vm1, %v23_v5  ;;  %1454 = vmatmul.mubr.msk.f32.vlgmr.msra.gmra.mrb[0].mxu1 %vm43_vm1, %v23_v5 }
   0x7   :  { %171 = vmatprep.mubr.f32.mxu0 %v1720_v4  ;;  %332 = vmatprep.mubr.f32.mxu1 %v1720_v4 }
   0x8   :  { %505 = vperm.xlu0 %1668, %v423_v8   ;;  %520 = vperm.xlu1 %1669, %v426_v11  }
   0xa   :  { %1437 = vmatmul.mubr.msk.f32.gmra.mrb[2].mxu0 %vm43_vm1, %v24_v7  ;;  %1455 = vmatmul.mubr.msk.f32.gmra.mrb[2].mxu1 %vm43_vm1, %v24_v7 }
   0xb   :  { %177 = vmatprep.mubr.f32.mxu0 %v1720_v4  ;;  %338 = vmatprep.mubr.f32.mxu1 %v1720_v4 }
   0xc   :  { %510 = vperm.xlu0 %1668, %v424_v10  }
   0xd   :  { %12 = vsyncpa [#allocation5], 0  ;;  %v427_v13 = vld [vmem:[%s2778_s3 + $0x20] sm:$0xff]  ;;  %v428_v14 = vld [vmem:[%s2778_s3 + $0x28] sm:$0xff] }
   0xe   :  { %1438 = vmatmul.mubr.msk.f32.gmra.mrb[4].mxu0 %vm43_vm1, %v25_v12  ;;  %1456 = vmatmul.mubr.msk.f32.gmra.mrb[4].mxu1 %vm43_vm1, %v25_v12  ;;  %v26_v15 = vld [vmem:[%s2776_s1 + $0x18] sm:$0xff]  ;;  %v429_v16 = vld [vmem:[%s2778_s3 + $0x30] sm:$0xff]  ;;  %v27_v18 = vld [vmem:[%s2776_s1 + $0x20] sm:$0xff] }
   0xf   :  { %183 = vmatprep.mubr.f32.mxu0 %v1720_v4  ;;  %344 = vmatprep.mubr.f32.mxu1 %v1720_v4  ;;  %v430_v17 = vld [vmem:[%s2778_s3 + $0x38] sm:$0xff]  ;;  %v431_v19 = vld [vmem:[%s2778_s3 + $0x40] sm:$0xff]  ;;  %v432_v20 = vld [vmem:[%s2778_s3 + $0x48] sm:$0xff] }
  0x10   :  { %525 = vperm.xlu0 %1668, %v427_v13   ;;  %530 = vperm.xlu1 %1669, %v428_v14   ;;  %v28_v21 = vld [vmem:[%s2776_s1 + $0x28] sm:$0xff]  ;;  %v433_v22 = vld [vmem:[%s2778_s3 + $0x50] sm:$0xff]  ;;  %v434_v23 = vld [vmem:[%s2778_s3 + $0x58] sm:$0xff] }
  0x11   :  { %v29_v24 = vld [vmem:[%s2776_s1 + $0x30] sm:$0xff]  ;;  %v435_v25 = vld [vmem:[%s2778_s3 + $0x60] sm:$0xff]  ;;  %v436_v26 = vld [vmem:[%s2778_s3 + $0x68] sm:$0xff] }
  0x12   :  { %1439 = vmatmul.mubr.msk.f32.gmra.mrb[6].mxu0 %vm43_vm1, %v26_v15  ;;  %1457 = vmatmul.mubr.msk.f32.gmra.mrb[6].mxu1 %vm43_vm1, %v26_v15  ;;  %v30_v27 = vld [vmem:[%s2776_s1 + $0x38] sm:$0xff]  ;;  %v437_v28 = vld [vmem:[%s2778_s3 + $0x70] sm:$0xff]  ;;  %v31_v30 = vld [vmem:[%s2776_s1 + $0x40] sm:$0xff] }
  0x13   :  { %189 = vmatprep.mubr.f32.mxu0 %v1720_v4  ;;  %350 = vmatprep.mubr.f32.mxu1 %v1720_v4  ;;  %v438_v29 = vld [vmem:[%s2778_s3 + $0x78] sm:$0xff]  ;;  %v32_v31 = vld [vmem:[%s2776_s1 + $0x48] sm:$0xff]  ;;  %v33_v32 = vld [vmem:[%s2776_s1 + $0x50] sm:$0xff] }
  0x14   :  { %535 = vperm.xlu0 %1668, %v429_v16   ;;  %540 = vperm.xlu1 %1669, %v430_v17   ;;  %v34_v33 = vld [vmem:[%s2776_s1 + $0x58] sm:$0xff]  ;;  %v35_v34 = vld [vmem:[%s2776_s1 + $0x60] sm:$0xff]  ;;  %v36_v35 = vld [vmem:[%s2776_s1 + $0x68] sm:$0xff] }
  0x15   :  { %v37_v36 = vld [vmem:[%s2776_s1 + $0x70] sm:$0xff]  ;;  %v38_v37 = vld [vmem:[%s2776_s1 + $0x78] sm:$0xff] }
  0x16   :  { %1440 = vmatmul.mubr.msk.f32.gmra.mrb[8].mxu0 %vm43_vm1, %v27_v18  ;;  %1458 = vmatmul.mubr.msk.f32.gmra.mrb[8].mxu1 %vm43_vm1, %v27_v18 }
  0x17   :  { %195 = vmatprep.mubr.f32.mxu0 %v1720_v4  ;;  %356 = vmatprep.mubr.f32.mxu1 %v1720_v4 }
  0x18   :  { %545 = vperm.xlu0 %1668, %v431_v19   ;;  %550 = vperm.xlu1 %1669, %v432_v20  }
  0x1a   :  { %1441 = vmatmul.mubr.msk.f32.gmra.mrb[10].mxu0 %vm43_vm1, %v28_v21  ;;  %1459 = vmatmul.mubr.msk.f32.gmra.mrb[10].mxu1 %vm43_vm1, %v28_v21 }
  0x1b   :  { %201 = vmatprep.mubr.f32.mxu0 %v1720_v4  ;;  %362 = vmatprep.mubr.f32.mxu1 %v1720_v4 }
  0x1c   :  { %555 = vperm.xlu0 %1668, %v433_v22   ;;  %560 = vperm.xlu1 %1669, %v434_v23  }
  0x1e   :  { %1442 = vmatmul.mubr.msk.f32.gmra.mrb[12].mxu0 %vm43_vm1, %v29_v24  ;;  %1460 = vmatmul.mubr.msk.f32.gmra.mrb[12].mxu1 %vm43_vm1, %v29_v24 }
  0x1f   :  { %207 = vmatprep.mubr.f32.mxu0 %v1720_v4  ;;  %368 = vmatprep.mubr.f32.mxu1 %v1720_v4 }
  0x20   :  { %565 = vperm.xlu0 %1668, %v435_v25   ;;  %570 = vperm.xlu1 %1669, %v436_v26  }
  0x22   :  { %1443 = vmatmul.mubr.msk.f32.gmra.mrb[14].mxu0 %vm43_vm1, %v30_v27  ;;  %1461 = vmatmul.mubr.msk.f32.gmra.mrb[14].mxu1 %vm43_vm1, %v30_v27 }
  0x23   :  { %213 = vmatprep.mubr.f32.mxu0 %v1720_v4  ;;  %374 = vmatprep.mubr.f32.mxu1 %v1720_v4 }
  0x24   :  { %575 = vperm.xlu0 %1668, %v437_v28   ;;  %580 = vperm.xlu1 %1669, %v438_v29  }
  0x26   :  { %1444 = vmatmul.mubr.msk.f32.gmra.mrb[16].mxu0 %vm43_vm1, %v31_v30  ;;  %1462 = vmatmul.mubr.msk.f32.gmra.mrb[16].mxu1 %vm43_vm1, %v31_v30 }
  0x27   :  { %219 = vmatprep.mubr.f32.mxu0 %v1720_v4  ;;  %380 = vmatprep.mubr.f32.mxu1 %v1720_v4 }
  0x2a   :  { %1445 = vmatmul.mubr.msk.f32.gmra.mrb[18].mxu0 %vm43_vm1, %v32_v31  ;;  %1463 = vmatmul.mubr.msk.f32.gmra.mrb[18].mxu1 %vm43_vm1, %v32_v31 }
  0x2b   :  { %225 = vmatprep.mubr.f32.mxu0 %v1720_v4  ;;  %386 = vmatprep.mubr.f32.mxu1 %v1720_v4 }
  0x2e   :  { %1446 = vmatmul.mubr.msk.f32.gmra.mrb[20].mxu0 %vm43_vm1, %v33_v32  ;;  %1464 = vmatmul.mubr.msk.f32.gmra.mrb[20].mxu1 %vm43_vm1, %v33_v32 }
  0x2f   :  { %231 = vmatprep.mubr.f32.mxu0 %v1720_v4  ;;  %392 = vmatprep.mubr.f32.mxu1 %v1720_v4 }
  0x32   :  { %1447 = vmatmul.mubr.msk.f32.gmra.mrb[22].mxu0 %vm43_vm1, %v34_v33  ;;  %1465 = vmatmul.mubr.msk.f32.gmra.mrb[22].mxu1 %vm43_vm1, %v34_v33 }
  0x33   :  { %237 = vmatprep.mubr.f32.mxu0 %v1720_v4  ;;  %398 = vmatprep.mubr.f32.mxu1 %v1720_v4 }
  0x36   :  { %1448 = vmatmul.mubr.msk.f32.gmra.mrb[24].mxu0 %vm43_vm1, %v35_v34  ;;  %1466 = vmatmul.mubr.msk.f32.gmra.mrb[24].mxu1 %vm43_vm1, %v35_v34 }
  0x37   :  { %243 = vmatprep.mubr.f32.mxu0 %v1720_v4  ;;  %404 = vmatprep.mubr.f32.mxu1 %v1720_v4 }
  0x3a   :  { %1449 = vmatmul.mubr.msk.f32.gmra.mrb[26].mxu0 %vm43_vm1, %v36_v35  ;;  %1467 = vmatmul.mubr.msk.f32.gmra.mrb[26].mxu1 %vm43_vm1, %v36_v35 }
  0x3b   :  { %249 = vmatprep.mubr.f32.mxu0 %v1720_v4  ;;  %410 = vmatprep.mubr.f32.mxu1 %v1720_v4 }
  0x3e   :  { %1450 = vmatmul.mubr.msk.f32.gmra.mrb[28].mxu0 %vm43_vm1, %v37_v36  ;;  %1468 = vmatmul.mubr.msk.f32.gmra.mrb[28].mxu1 %vm43_vm1, %v37_v36 }
  0x3f   :  { %255 = vmatprep.mubr.f32.mxu0 %v1720_v4  ;;  %416 = vmatprep.mubr.f32.mxu1 %v1720_v4 }
  0x42   :  { %1451 = vmatmul.mubr.msk.f32.gmra.mrb[30].mxu0 %vm43_vm1, %v38_v37  ;;  %1469 = vmatmul.mubr.msk.f32.gmra.mrb[30].mxu1 %vm43_vm1, %v38_v37 }
  0x43   :  { %1289 = vmatprep.mubr.f32.mxu0 %v1720_v4  ;;  %1360 = vmatprep.mubr.f32.mxu1 %v1720_v4 }
  0x82   :  { %v516_v60 = vpop.permute.xlu1 %515 }
  0x87   :  { %v506_v38 = vpop.permute.xlu0 %505  ;;  %v521_v27 = vpop.permute.xlu1 %520 }
  0x8b   :  { %v511_v45 = vpop.permute.xlu0 %510 }
  0xd9   :  { %v167_v39 = vpop.f32.mrb[0].mxu0  ;;  %v328_v40 = vpop.f32.mrb[0].mxu1 }
  0xda   :  { %v169_v41 = vpop.f32.mrb[1].mxu0  ;;  %v330_v42 = vpop.f32.mrb[1].mxu1  ;;  %v439_v43 = vmul.f32 2.0, %v167_v39  ;;  %v441_v44 = vmul.f32 2.0, %v328_v40 }
  0xdb   :  { %v440_v46 = vmul.f32 2.0, %v169_v41  ;;  %v442_v47 = vmul.f32 2.0, %v330_v42  ;;  %v526_v42 = vpop.permute.xlu0 %525 }
  0xdc   :  { %v1924_v56 = vsub.f32 %v506_v38, %v439_v43  ;;  %v1926_v57 = vsub.f32 %v506_v38, %v441_v44 }
  0xdd   :  { %v173_v48 = vpop.f32.mrb[2].mxu0  ;;  %v334_v49 = vpop.f32.mrb[2].mxu1  ;;  %v1932_v61 = vsub.f32 %v506_v38, %v440_v46  ;;  %v1934_v62 = vsub.f32 %v506_v38, %v442_v47 }
  0xde   :  { %v443_v50 = vmul.f32 2.0, %v173_v48  ;;  %v445_v51 = vmul.f32 2.0, %v334_v49  ;;  %v175_v52 = vpop.f32.mrb[3].mxu0  ;;  %v336_v53 = vpop.f32.mrb[3].mxu1 }
  0xdf   :  { %v444_v54 = vmul.f32 2.0, %v175_v52  ;;  %v446_v55 = vmul.f32 2.0, %v336_v53  ;;  %2831 = vst [vmem:[#allocation8_spill] sm:$0xff] %v1934_v62 }
  0xe0   :  { %v1928_v58 = vsub.f32 %v511_v45, %v443_v50  ;;  %v1930_v59 = vsub.f32 %v511_v45, %v445_v51 }
  0xe1   :  { %v1936_v63 = vsub.f32 %v511_v45, %v444_v54  ;;  %v1938_v0 = vsub.f32 %v511_v45, %v446_v55  ;;  %v179_v1 = vpop.f32.mrb[4].mxu0  ;;  %v340_v2 = vpop.f32.mrb[4].mxu1 }
  0xe2   :  { %v447_v3 = vmul.f32 2.0, %v179_v1  ;;  %v647_v4 = vmin.f32 %v1924_v56, %v1928_v58  ;;  %v449_v5 = vmul.f32 2.0, %v340_v2  ;;  %v689_v6 = vmin.f32 %v1926_v57, %v1930_v59  ;;  %v181_v7 = vpop.f32.mrb[5].mxu0  ;;  %v342_v8 = vpop.f32.mrb[5].mxu1 }
  0xe3   :  { %2832 = vst [vmem:[#allocation9_spill] sm:$0xff] %v1938_v0  ;;  %v448_v9 = vmul.f32 2.0, %v181_v7  ;;  %v668_v10 = vmin.f32 %v1932_v61, %v1936_v63  ;;  %v450_v11 = vmul.f32 2.0, %v342_v8  ;;  %v710_v12 = vmin.f32 %v1934_v62, %v1938_v0 }
  0xe4   :  { %v1948_v13 = vsub.f32 %v516_v60, %v447_v3  ;;  %v1950_v14 = vsub.f32 %v516_v60, %v449_v5  ;;  %v531_v3 = vpop.permute.xlu1 %530 }
  0xe5   :  { %v1952_v15 = vsub.f32 %v516_v60, %v448_v9  ;;  %v1954_v16 = vsub.f32 %v516_v60, %v450_v11  ;;  %v185_v17 = vpop.f32.mrb[6].mxu0  ;;  %v346_v18 = vpop.f32.mrb[6].mxu1 }
  0xe6   :  { %v648_v19 = vmin.f32 %v647_v4, %v1948_v13  ;;  %v690_v20 = vmin.f32 %v689_v6, %v1950_v14  ;;  %v451_v21 = vmul.f32 2.0, %v185_v17  ;;  %v453_v22 = vmul.f32 2.0, %v346_v18  ;;  %v187_v23 = vpop.f32.mrb[7].mxu0  ;;  %v348_v24 = vpop.f32.mrb[7].mxu1 }
  0xe7   :  { %2833 = vst [vmem:[#allocation10_spill] sm:$0xff] %v1954_v16  ;;  %v669_v25 = vmin.f32 %v668_v10, %v1952_v15  ;;  %v711_v26 = vmin.f32 %v710_v12, %v1954_v16  ;;  %v452_v28 = vmul.f32 2.0, %v187_v23  ;;  %v454_v29 = vmul.f32 2.0, %v348_v24  ;;  %v536_v24 = vpop.permute.xlu0 %535 }
  0xe8   :  { %v1960_v30 = vsub.f32 %v521_v27, %v451_v21  ;;  %v1962_v31 = vsub.f32 %v521_v27, %v453_v22 }
  0xe9   :  { %v1964_v32 = vsub.f32 %v521_v27, %v452_v28  ;;  %v1966_v33 = vsub.f32 %v521_v27, %v454_v29  ;;  %v191_v34 = vpop.f32.mrb[8].mxu0  ;;  %v352_v35 = vpop.f32.mrb[8].mxu1 }
  0xea   :  { %v649_v36 = vmin.f32 %v648_v19, %v1960_v30  ;;  %v691_v37 = vmin.f32 %v690_v20, %v1962_v31  ;;  %v455_v38 = vmul.f32 2.0, %v191_v34  ;;  %v457_v39 = vmul.f32 2.0, %v352_v35  ;;  %v193_v40 = vpop.f32.mrb[9].mxu0  ;;  %v354_v41 = vpop.f32.mrb[9].mxu1 }
  0xeb   :  { %2834 = vst [vmem:[#allocation11_spill] sm:$0xff] %v1966_v33  ;;  %v670_v43 = vmin.f32 %v669_v25, %v1964_v32  ;;  %v712_v44 = vmin.f32 %v711_v26, %v1966_v33  ;;  %v456_v45 = vmul.f32 2.0, %v193_v40  ;;  %v458_v46 = vmul.f32 2.0, %v354_v41 }
  0xec   :  { %v1972_v47 = vsub.f32 %v526_v42, %v455_v38  ;;  %v1974_v48 = vsub.f32 %v526_v42, %v457_v39 }
  0xed   :  { %v1976_v49 = vsub.f32 %v526_v42, %v456_v45  ;;  %v1978_v50 = vsub.f32 %v526_v42, %v458_v46  ;;  %v197_v51 = vpop.f32.mrb[10].mxu0  ;;  %v358_v52 = vpop.f32.mrb[10].mxu1 }
  0xee   :  { %v650_v53 = vmin.f32 %v649_v36, %v1972_v47  ;;  %v692_v54 = vmin.f32 %v691_v37, %v1974_v48  ;;  %v459_v55 = vmul.f32 2.0, %v197_v51  ;;  %v461_v60 = vmul.f32 2.0, %v358_v52  ;;  %v199_v1 = vpop.f32.mrb[11].mxu0  ;;  %v360_v2 = vpop.f32.mrb[11].mxu1 }
  0xef   :  { %2835 = vst [vmem:[#allocation12_spill] sm:$0xff] %v1978_v50  ;;  %v671_v4 = vmin.f32 %v670_v43, %v1976_v49  ;;  %v713_v5 = vmin.f32 %v712_v44, %v1978_v50  ;;  %v460_v6 = vmul.f32 2.0, %v199_v1  ;;  %v462_v7 = vmul.f32 2.0, %v360_v2  ;;  %v541_v45 = vpop.permute.xlu1 %540 }
  0xf0   :  { %v1984_v8 = vsub.f32 %v531_v3, %v459_v55  ;;  %v1986_v9 = vsub.f32 %v531_v3, %v461_v60 }
  0xf1   :  { %v1988_v10 = vsub.f32 %v531_v3, %v460_v6  ;;  %v1990_v11 = vsub.f32 %v531_v3, %v462_v7  ;;  %v203_v12 = vpop.f32.mrb[12].mxu0  ;;  %v364_v17 = vpop.f32.mrb[12].mxu1 }
  0xf2   :  { %v651_v18 = vmin.f32 %v650_v53, %v1984_v8  ;;  %v693_v19 = vmin.f32 %v692_v54, %v1986_v9  ;;  %v463_v20 = vmul.f32 2.0, %v203_v12  ;;  %v465_v21 = vmul.f32 2.0, %v364_v17  ;;  %v205_v22 = vpop.f32.mrb[13].mxu0  ;;  %v366_v23 = vpop.f32.mrb[13].mxu1 }
  0xf3   :  { %2836 = vst [vmem:[#allocation13_spill] sm:$0xff] %v1990_v11  ;;  %v672_v25 = vmin.f32 %v671_v4, %v1988_v10  ;;  %v714_v26 = vmin.f32 %v713_v5, %v1990_v11  ;;  %v464_v27 = vmul.f32 2.0, %v205_v22  ;;  %v466_v28 = vmul.f32 2.0, %v366_v23 }
  0xf4   :  { %v1996_v29 = vsub.f32 %v536_v24, %v463_v20  ;;  %v1998_v34 = vsub.f32 %v536_v24, %v465_v21 }
  0xf5   :  { %v2000_v35 = vsub.f32 %v536_v24, %v464_v27  ;;  %v2002_v36 = vsub.f32 %v536_v24, %v466_v28  ;;  %v209_v37 = vpop.f32.mrb[14].mxu0  ;;  %v370_v38 = vpop.f32.mrb[14].mxu1 }
  0xf6   :  { %v652_v39 = vmin.f32 %v651_v18, %v1996_v29  ;;  %v694_v40 = vmin.f32 %v693_v19, %v1998_v34  ;;  %v467_v41 = vmul.f32 2.0, %v209_v37  ;;  %v469_v42 = vmul.f32 2.0, %v370_v38  ;;  %v211_v43 = vpop.f32.mrb[15].mxu0  ;;  %v372_v44 = vpop.f32.mrb[15].mxu1 }
  0xf7   :  { %2837 = vst [vmem:[#allocation14_spill] sm:$0xff] %v2002_v36  ;;  %v673_v46 = vmin.f32 %v672_v25, %v2000_v35  ;;  %v715_v51 = vmin.f32 %v714_v26, %v2002_v36  ;;  %v468_v52 = vmul.f32 2.0, %v211_v43  ;;  %v470_v53 = vmul.f32 2.0, %v372_v44  ;;  %v546_v18 = vpop.permute.xlu0 %545  ;;  %v551_v43 = vpop.permute.xlu1 %550 }
  0xf8   :  { %v2008_v54 = vsub.f32 %v541_v45, %v467_v41  ;;  %v2010_v55 = vsub.f32 %v541_v45, %v469_v42 }
  0xf9   :  { %v2012_v60 = vsub.f32 %v541_v45, %v468_v52  ;;  %v2014_v1 = vsub.f32 %v541_v45, %v470_v53  ;;  %v215_v2 = vpop.f32.mrb[16].mxu0  ;;  %v376_v3 = vpop.f32.mrb[16].mxu1 }
  0xfa   :  { %v653_v4 = vmin.f32 %v652_v39, %v2008_v54  ;;  %v695_v5 = vmin.f32 %v694_v40, %v2010_v55  ;;  %v471_v6 = vmul.f32 2.0, %v215_v2  ;;  %v473_v7 = vmul.f32 2.0, %v376_v3  ;;  %v217_v12 = vpop.f32.mrb[17].mxu0  ;;  %v378_v17 = vpop.f32.mrb[17].mxu1 }
  0xfb   :  { %2838 = vst [vmem:[#allocation15_spill] sm:$0xff] %v2014_v1  ;;  %v674_v19 = vmin.f32 %v673_v46, %v2012_v60  ;;  %v716_v20 = vmin.f32 %v715_v51, %v2014_v1  ;;  %v472_v21 = vmul.f32 2.0, %v217_v12  ;;  %v474_v22 = vmul.f32 2.0, %v378_v17 }
  0xfc   :  { %v2020_v23 = vsub.f32 %v546_v18, %v471_v6  ;;  %v2022_v24 = vsub.f32 %v546_v18, %v473_v7 }
  0xfd   :  { %v2024_v25 = vsub.f32 %v546_v18, %v472_v21  ;;  %v2026_v26 = vsub.f32 %v546_v18, %v474_v22  ;;  %v221_v27 = vpop.f32.mrb[18].mxu0  ;;  %v382_v28 = vpop.f32.mrb[18].mxu1 }
  0xfe   :  { %v654_v37 = vmin.f32 %v653_v4, %v2020_v23  ;;  %v696_v38 = vmin.f32 %v695_v5, %v2022_v24  ;;  %v475_v39 = vmul.f32 2.0, %v221_v27  ;;  %v477_v40 = vmul.f32 2.0, %v382_v28  ;;  %v223_v41 = vpop.f32.mrb[19].mxu0  ;;  %v384_v42 = vpop.f32.mrb[19].mxu1 }
  0xff   :  { %2839 = vst [vmem:[#allocation16_spill] sm:$0xff] %v2026_v26  ;;  %v675_v44 = vmin.f32 %v674_v19, %v2024_v25  ;;  %v717_v45 = vmin.f32 %v716_v20, %v2026_v26  ;;  %v476_v46 = vmul.f32 2.0, %v223_v41  ;;  %v478_v51 = vmul.f32 2.0, %v384_v42  ;;  %v556_v20 = vpop.permute.xlu0 %555 }
 0x100   :  { %v2032_v52 = vsub.f32 %v551_v43, %v475_v39  ;;  %v2034_v53 = vsub.f32 %v551_v43, %v477_v40 }
 0x101   :  { %v2036_v2 = vsub.f32 %v551_v43, %v476_v46  ;;  %v2038_v3 = vsub.f32 %v551_v43, %v478_v51  ;;  %v227_v4 = vpop.f32.mrb[20].mxu0  ;;  %v388_v5 = vpop.f32.mrb[20].mxu1 }
 0x102   :  { %v655_v6 = vmin.f32 %v654_v37, %v2032_v52  ;;  %v697_v7 = vmin.f32 %v696_v38, %v2034_v53  ;;  %v479_v12 = vmul.f32 2.0, %v227_v4  ;;  %v481_v17 = vmul.f32 2.0, %v388_v5  ;;  %v229_v18 = vpop.f32.mrb[21].mxu0  ;;  %v390_v19 = vpop.f32.mrb[21].mxu1 }
 0x103   :  { %2840 = vst [vmem:[#allocation17_spill] sm:$0xff] %v2036_v2  ;;  %2841 = vst [vmem:[#allocation18_spill] sm:$0xff] %v2038_v3  ;;  %v676_v21 = vmin.f32 %v675_v44, %v2036_v2  ;;  %v718_v22 = vmin.f32 %v717_v45, %v2038_v3  ;;  %v480_v27 = vmul.f32 2.0, %v229_v18  ;;  %v482_v28 = vmul.f32 2.0, %v390_v19  ;;  %v561_v5 = vpop.permute.xlu1 %560 }
 0x104   :  { %v2044_v39 = vsub.f32 %v556_v20, %v479_v12  ;;  %v2046_v40 = vsub.f32 %v556_v20, %v481_v17 }
 0x105   :  { %v2048_v41 = vsub.f32 %v556_v20, %v480_v27  ;;  %v2050_v37 = vsub.f32 %v556_v20, %v482_v28  ;;  %v233_v38 = vpop.f32.mrb[22].mxu0  ;;  %v394_v42 = vpop.f32.mrb[22].mxu1 }
 0x106   :  { %v656_v43 = vmin.f32 %v655_v6, %v2044_v39  ;;  %v698_v46 = vmin.f32 %v697_v7, %v2046_v40  ;;  %v483_v51 = vmul.f32 2.0, %v233_v38  ;;  %v485_v44 = vmul.f32 2.0, %v394_v42  ;;  %v235_v4 = vpop.f32.mrb[23].mxu0  ;;  %v396_v45 = vpop.f32.mrb[23].mxu1 }
 0x107   :  { %2842 = vst [vmem:[#allocation19_spill] sm:$0xff] %v2048_v41  ;;  %2843 = vst [vmem:[#allocation20_spill] sm:$0xff] %v2050_v37  ;;  %v677_v12 = vmin.f32 %v676_v21, %v2048_v41  ;;  %v719_v17 = vmin.f32 %v718_v22, %v2050_v37  ;;  %v484_v18 = vmul.f32 2.0, %v235_v4  ;;  %v486_v19 = vmul.f32 2.0, %v396_v45  ;;  %v566_v4 = vpop.permute.xlu0 %565 }
 0x108   :  { %v2056_v27 = vsub.f32 %v561_v5, %v483_v51  ;;  %v2058_v20 = vsub.f32 %v561_v5, %v485_v44 }
 0x109   :  { %v2060_v28 = vsub.f32 %v561_v5, %v484_v18  ;;  %v2062_v6 = vsub.f32 %v561_v5, %v486_v19  ;;  %v239_v7 = vpop.f32.mrb[24].mxu0  ;;  %v400_v38 = vpop.f32.mrb[24].mxu1 }
 0x10a   :  { %v657_v42 = vmin.f32 %v656_v43, %v2056_v27  ;;  %v699_v3 = vmin.f32 %v698_v46, %v2058_v20  ;;  %v487_v26 = vmul.f32 2.0, %v239_v7  ;;  %v489_v21 = vmul.f32 2.0, %v400_v38  ;;  %v241_v1 = vpop.f32.mrb[25].mxu0  ;;  %v402_v22 = vpop.f32.mrb[25].mxu1 }
 0x10b   :  { %2844 = vst [vmem:[#allocation21_spill] sm:$0xff] %v2060_v28  ;;  %2845 = vst [vmem:[#allocation22_spill] sm:$0xff] %v2062_v6  ;;  %v678_v51 = vmin.f32 %v677_v12, %v2060_v28  ;;  %v720_v44 = vmin.f32 %v719_v17, %v2062_v6  ;;  %v488_v45 = vmul.f32 2.0, %v241_v1  ;;  %v490_v18 = vmul.f32 2.0, %v402_v22  ;;  %v571_v1 = vpop.permute.xlu1 %570 }
 0x10c   :  { %v2068_v37 = vsub.f32 %v566_v4, %v487_v26  ;;  %v2070_v5 = vsub.f32 %v566_v4, %v489_v21 }
 0x10d   :  { %v2072_v19 = vsub.f32 %v566_v4, %v488_v45  ;;  %v2074_v43 = vsub.f32 %v566_v4, %v490_v18  ;;  %v245_v46 = vpop.f32.mrb[26].mxu0  ;;  %v406_v7 = vpop.f32.mrb[26].mxu1 }
 0x10e   :  { %v658_v38 = vmin.f32 %v657_v42, %v2068_v37  ;;  %v700_v36 = vmin.f32 %v699_v3, %v2070_v5  ;;  %v491_v11 = vmul.f32 2.0, %v245_v46  ;;  %v493_v12 = vmul.f32 2.0, %v406_v7  ;;  %v247_v50 = vpop.f32.mrb[27].mxu0  ;;  %v408_v17 = vpop.f32.mrb[27].mxu1 }
 0x10f   :  { %2846 = vst [vmem:[#allocation23_spill] sm:$0xff] %v2072_v19  ;;  %2847 = vst [vmem:[#allocation24_spill] sm:$0xff] %v2074_v43  ;;  %v679_v26 = vmin.f32 %v678_v51, %v2072_v19  ;;  %v721_v21 = vmin.f32 %v720_v44, %v2074_v43  ;;  %v492_v22 = vmul.f32 2.0, %v247_v50  ;;  %v494_v45 = vmul.f32 2.0, %v408_v17  ;;  %v576_v50 = vpop.permute.xlu0 %575 }
 0x110   :  { %v2080_v6 = vsub.f32 %v571_v1, %v491_v11  ;;  %v2082_v4 = vsub.f32 %v571_v1, %v493_v12 }
 0x111   :  { %v2084_v18 = vsub.f32 %v571_v1, %v492_v22  ;;  %v2086_v42 = vsub.f32 %v571_v1, %v494_v45  ;;  %v251_v3 = vpop.f32.mrb[28].mxu0  ;;  %v412_v46 = vpop.f32.mrb[28].mxu1 }
 0x112   :  { %v659_v7 = vmin.f32 %v658_v38, %v2080_v6  ;;  %v701_v33 = vmin.f32 %v700_v36, %v2082_v4  ;;  %v495_v16 = vmul.f32 2.0, %v251_v3  ;;  %v497_v51 = vmul.f32 2.0, %v412_v46  ;;  %v253_v0 = vpop.f32.mrb[29].mxu0  ;;  %v414_v44 = vpop.f32.mrb[29].mxu1 }
 0x113   :  { %2848 = vst [vmem:[#allocation25_spill] sm:$0xff] %v2084_v18  ;;  %2849 = vst [vmem:[#allocation26_spill] sm:$0xff] %v2086_v42  ;;  %v680_v11 = vmin.f32 %v679_v26, %v2084_v18  ;;  %v722_v12 = vmin.f32 %v721_v21, %v2086_v42  ;;  %v496_v17 = vmul.f32 2.0, %v253_v0  ;;  %v498_v22 = vmul.f32 2.0, %v414_v44  ;;  %v581_v0 = vpop.permute.xlu1 %580 }
 0x114   :  { %v2092_v43 = vsub.f32 %v576_v50, %v495_v16  ;;  %v2094_v1 = vsub.f32 %v576_v50, %v497_v51 }
 0x115   :  { %v2096_v45 = vsub.f32 %v576_v50, %v496_v17  ;;  %v2098_v38 = vsub.f32 %v576_v50, %v498_v22  ;;  %v257_v36 = vpop.f32.mrb[30].mxu0  ;;  %v418_v3 = vpop.f32.mrb[30].mxu1 }
 0x116   :  { %2850 = vst [vmem:[#allocation27_spill] sm:$0xff] %v2094_v1  ;;  %v660_v46 = vmin.f32 %v659_v7, %v2092_v43  ;;  %v702_v62 = vmin.f32 %v701_v33, %v2094_v1  ;;  %v499_v19 = vmul.f32 2.0, %v257_v36  ;;  %v501_v26 = vmul.f32 2.0, %v418_v3  ;;  %v259_v18 = vpop.f32.mrb[31].mxu0  ;;  %v420_v21 = vpop.f32.mrb[31].mxu1 }
 0x117   :  { %2851 = vst [vmem:[#allocation28_spill] sm:$0xff] %v2096_v45  ;;  %2852 = vst [vmem:[#allocation29_spill] sm:$0xff] %v2098_v38  ;;  %v681_v16 = vmin.f32 %v680_v11, %v2096_v45  ;;  %v723_v51 = vmin.f32 %v722_v12, %v2098_v38  ;;  %v500_v44 = vmul.f32 2.0, %v259_v18  ;;  %v502_v17 = vmul.f32 2.0, %v420_v21 }
 0x118   :  { %v2104_v42 = vsub.f32 %v581_v0, %v499_v19  ;;  %v2106_v50 = vsub.f32 %v581_v0, %v501_v26  ;;  %v2827_v18 = vlaneseq }
 0x119   :  { %v2108_v22 = vsub.f32 %v581_v0, %v500_v44  ;;  %v2110_v7 = vsub.f32 %v581_v0, %v502_v17 }
 0x11a   :  { %2853 = vst [vmem:[#allocation30_spill] sm:$0xff] %v2104_v42  ;;  %v661_v33 = vmin.f32 %v660_v46, %v2104_v42  ;;  %v703_v36 = vmin.f32 %v702_v62, %v2106_v50  ;;  %v2117_v17 = vshrl.u32 %v2827_v18, 7 }
 0x11b   :  { %2854 = vst [vmem:[#allocation31_spill] sm:$0xff] %v2108_v22  ;;  %2855 = vst [vmem:[#allocation32_spill] sm:$0xff] %v2110_v7  ;;  %v682_v3 = vmin.f32 %v681_v16, %v2108_v22  ;;  %v724_v11 = vmin.f32 %v723_v51, %v2110_v7 }
 0x11c   :  { %v662_v45 = vrot.slane %v661_v33, 4  ;;  %v704_v12 = vrot.slane %v703_v36, 4  ;;  %v2120_v51 = vadd.s32 8, %v2117_v17  ;;  %v2123_v7 = vadd.s32 16, %v2117_v17 }
 0x11d   :  { %v683_v21 = vrot.slane %v682_v3, 4  ;;  %v725_v19 = vrot.slane %v724_v11, 4 }
 0x11e   :  { %v663_v38 = vmin.f32 %v661_v33, %v662_v45  ;;  %v705_v26 = vmin.f32 %v703_v36, %v704_v12  ;;  %v2128_v33 = vadd.s32 24, %v2117_v17  ;;  %v2131_v36 = vadd.s32 32, %v2117_v17 }
 0x11f   :  { %v684_v28 = vmin.f32 %v682_v3, %v683_v21  ;;  %v726_v44 = vmin.f32 %v724_v11, %v725_v19  ;;  %v2183_v19 = vadd.s32 80, %v2117_v17 }
 0x120   :  { %v664_v41 = vrot.slane %v663_v38, 2  ;;  %v706_v0 = vrot.slane %v705_v26, 2 }
 0x121   :  { %v685_v2 = vrot.slane %v684_v28, 2  ;;  %v727_v16 = vrot.slane %v726_v44, 2 }
 0x122   :  { %v665_v46 = vmin.f32 %v663_v38, %v664_v41  ;;  %v707_v62 = vmin.f32 %v705_v26, %v706_v0  ;;  %v2134_v41 = vadd.s32 40, %v2117_v17  ;;  %v2137_v38 = vadd.s32 48, %v2117_v17 }
 0x123   :  { %v686_v11 = vmin.f32 %v684_v28, %v685_v2  ;;  %v728_v12 = vmin.f32 %v726_v44, %v727_v16  ;;  %v2172_v2 = vadd.s32 56, %v2117_v17  ;;  %v2175_v28 = vadd.s32 64, %v2117_v17 }
 0x124   :  { %v666_v22 = vrot.slane %v665_v46, 1  ;;  %v708_v3 = vrot.slane %v707_v62, 1  ;;  %v2186_v26 = vadd.s32 88, %v2117_v17  ;;  %v2203_v16 = vadd.s32 112, %v2117_v17 }
 0x125   :  { %v687_v18 = vrot.slane %v686_v11, 1  ;;  %v729_v42 = vrot.slane %v728_v12, 1 }
 0x126   :  { %v2125_v45 = vmin.f32 %v665_v46, %v666_v22  ;;  %v2178_v22 = vadd.s32 72, %v2117_v17  ;;  %v2180_v21 = vmin.f32 %v707_v62, %v708_v3  ;;  %v2197_v46 = vadd.s32 96, %v2117_v17 }
 0x127   :  { %v2200_v62 = vadd.s32 104, %v2117_v17  ;;  %v2206_v3 = vadd.s32 120, %v2117_v17  ;;  %v2262_v1 = vmin.f32 %v728_v12, %v729_v42 }
 0x128   :  { %vm748_vm2 = vcmp.eq.f32.partialorder %v1924_v56, %v2125_v45  ;;  %vm752_vm3 = vcmp.eq.f32.partialorder %v1928_v58, %v2125_v45  ;;  %vm756_vm4 = vcmp.eq.f32.partialorder %v1948_v13, %v2125_v45  ;;  %vm760_vm5 = vcmp.eq.f32.partialorder %v1960_v30, %v2125_v45 }
 0x129   :  { %vm764_vm6 = vcmp.eq.f32.partialorder %v1972_v47, %v2125_v45  ;;  %vm768_vm7 = vcmp.eq.f32.partialorder %v1984_v8, %v2125_v45  ;;  %vm772_vm8 = vcmp.eq.f32.partialorder %v1996_v29, %v2125_v45  ;;  %vm776_vm9 = vcmp.eq.f32.partialorder %v2008_v54, %v2125_v45  ;;  %2856 = vst [vmem:[#allocation33_spill] sm:$0xff] %v2206_v3 }
 0x12a   :  { %vm780_vm10 = vcmp.eq.f32.partialorder %v2020_v23, %v2125_v45  ;;  %vm784_vm11 = vcmp.eq.f32.partialorder %v2032_v52, %v2125_v45  ;;  %v812_v44 = vsel %vm748_vm2, %v2117_v17, 128  ;;  %v816_v0 = vsel %vm752_vm3, %v2120_v51, 128 }
 0x12b   :  { %v820_v56 = vsel %vm756_vm4, %v2123_v7, 128  ;;  %v824_v58 = vsel %vm760_vm5, %v2128_v33, 128  ;;  %vm876_vm2 = vcmp.lt.s32.totalorder %v812_v44, %v816_v0  ;;  %vm750_vm3 = vcmp.eq.f32.partialorder %v1926_v57, %v2180_v21 }
 0x12c   :  { %vm754_vm1 = vcmp.eq.f32.partialorder %v1930_v59, %v2180_v21  ;;  %v877_v3 = vsel %vm876_vm2, %v812_v44, %v816_v0  ;;  %vm786_vm2 = vcmp.eq.f32.partialorder %v2034_v53, %v2180_v21  ;;  %vm790_vm15 = vcmp.eq.f32.partialorder %v2046_v40, %v2180_v21 }
 0x12d   :  { %vm878_vm14 = vcmp.lt.s32.totalorder %v877_v3, %v820_v56  ;;  %vm794_vm5 = vcmp.eq.f32.partialorder %v2058_v20, %v2180_v21  ;;  %vm798_vm13 = vcmp.eq.f32.partialorder %v2070_v5, %v2180_v21  ;;  %v828_v30 = vsel %vm764_vm6, %v2131_v36, 128 }
 0x12e   :  { %v879_v13 = vsel %vm878_vm14, %v877_v3, %v820_v56  ;;  %v2252_v0 = vmin.f32 %v686_v11, %v687_v18  ;;  %v832_v3 = vsel %vm768_vm7, %v2134_v41, 128  ;;  %v836_v56 = vsel %vm772_vm8, %v2137_v38, 128 }
 0x12f   :  { %vm880_vm4 = vcmp.lt.s32.totalorder %v879_v13, %v824_v58  ;;  %v840_v47 = vsel %vm776_vm9, %v2172_v2, 128  ;;  %v814_v8 = vsel %vm750_vm3, %v2117_v17, 128  ;;  %v818_v29 = vsel %vm754_vm1, %v2120_v51, 128 }
 0x130   :  { %v881_v44 = vsel %vm880_vm4, %v879_v13, %v824_v58  ;;  %v844_v42 = vsel %vm780_vm10, %v2175_v28, 128  ;;  %v848_v54 = vsel %vm784_vm11, %v2178_v22, 128  ;;  %vm2857_vm6 = vcmp.eq.f32.partialorder %v2044_v39, %v2125_v45  ;;  %v2863_v13 = vld [vmem:[#allocation17_spill] sm:$0xff] }
 0x131   :  { %vm882_vm0 = vcmp.lt.s32.totalorder %v881_v44, %v828_v30  ;;  %v852_v57 = vsel %vm2857_vm6, %v2183_v19, 128  ;;  %vm2858_vm8 = vcmp.eq.f32.partialorder %v2056_v27, %v2125_v45  ;;  %vm2859_vm9 = vcmp.eq.f32.partialorder %v1950_v14, %v2180_v21 }
 0x132   :  { %v883_v18 = vsel %vm882_vm0, %v881_v44, %v828_v30  ;;  %v856_v59 = vsel %vm2858_vm8, %v2186_v26, 128  ;;  %v822_v23 = vsel %vm2859_vm9, %v2123_v7, 128  ;;  %vm2860_vm10 = vcmp.eq.f32.partialorder %v1962_v31, %v2180_v21  ;;  %v2864_v30 = vld [vmem:[#allocation19_spill] sm:$0xff]  ;;  %v2865_v44 = vld [vmem:[#allocation21_spill] sm:$0xff] }
 0x133   :  { %vm884_vm7 = vcmp.lt.s32.totalorder %v883_v18, %v832_v3  ;;  %v826_v52 = vsel %vm2860_vm10, %v2128_v33, 128  ;;  %vm2861_vm0 = vcmp.eq.f32.partialorder %v1974_v48, %v2180_v21  ;;  %vm2862_vm1 = vcmp.eq.f32.partialorder %v1986_v9, %v2180_v21 }
 0x134   :  { %v885_v11 = vsel %vm884_vm7, %v883_v18, %v832_v3  ;;  %v830_v39 = vsel %vm2861_vm0, %v2131_v36, 128  ;;  %v834_v27 = vsel %vm2862_vm1, %v2134_v41, 128  ;;  %vm954_vm3 = vcmp.lt.s32.totalorder %v814_v8, %v818_v29  ;;  %v2867_v18 = vld [vmem:[#allocation25_spill] sm:$0xff] }
 0x135   :  { %vm886_vm11 = vcmp.lt.s32.totalorder %v885_v11, %v836_v56  ;;  %v955_v14 = vsel %vm954_vm3, %v814_v8, %v818_v29  ;;  %vm749_vm4 = vcmp.eq.f32.partialorder %v1932_v61, %v2252_v0  ;;  %vm753_vm6 = vcmp.eq.f32.partialorder %v1936_v63, %v2252_v0  ;;  %v2868_v8 = vld [vmem:[#allocation28_spill] sm:$0xff]  ;;  %v2869_v29 = vld [vmem:[#allocation31_spill] sm:$0xff] }
 0x136   :  { %v887_v12 = vsel %vm886_vm11, %v885_v11, %v836_v56  ;;  %vm956_vm8 = vcmp.lt.s32.totalorder %v955_v14, %v822_v23  ;;  %vm789_vm0 = vcmp.eq.f32.partialorder %v2864_v30, %v2252_v0  ;;  %vm2870_vm9 = vcmp.eq.f32.partialorder %v2068_v37, %v2125_v45  ;;  %v2874_v37 = vld [vmem:[#allocation33_spill] sm:$0xff]  ;;  %v2880_v61 = vld [vmem:[#allocation27_spill] sm:$0xff] }
 0x137   :  { %vm888_vm7 = vcmp.lt.s32.totalorder %v887_v12, %v840_v47  ;;  %v957_v48 = vsel %vm956_vm8, %v955_v14, %v822_v23  ;;  %vm2873_vm14 = vcmp.eq.f32.partialorder %v2092_v43, %v2125_v45  ;;  %v850_v14 = vsel %vm786_vm2, %v2178_v22, 128 }
 0x138   :  { %v889_v31 = vsel %vm888_vm7, %v887_v12, %v840_v47  ;;  %vm958_vm3 = vcmp.lt.s32.totalorder %v957_v48, %v826_v52  ;;  %v2866_v47 = vld [vmem:[#allocation23_spill] sm:$0xff]  ;;  %v817_v53 = vsel %vm753_vm6, %v2120_v51, 128  ;;  %v862_v20 = vsel %vm798_vm13, %v2197_v46, 128 }
 0x139   :  { %vm890_vm1 = vcmp.lt.s32.totalorder %v889_v31, %v844_v42  ;;  %v959_v58 = vsel %vm958_vm3, %v957_v48, %v826_v52  ;;  %vm2881_vm2 = vcmp.eq.f32.partialorder %v2880_v61, %v2180_v21  ;;  %vm2882_vm6 = vcmp.eq.f32.partialorder %v1952_v15, %v2252_v0 }
 0x13a   :  { %v891_v9 = vsel %vm890_vm1, %v889_v31, %v844_v42  ;;  %vm960_vm10 = vcmp.lt.s32.totalorder %v959_v58, %v830_v39  ;;  %vm797_vm1 = vcmp.eq.f32.partialorder %v2866_v47, %v2252_v0  ;;  %v860_v42 = vsel %vm2870_vm9, %v2197_v46, 128 }
 0x13b   :  { %vm892_vm11 = vcmp.lt.s32.totalorder %v891_v9, %v848_v54  ;;  %v961_v56 = vsel %vm960_vm10, %v959_v58, %v830_v39  ;;  %vm2871_vm10 = vcmp.eq.f32.partialorder %v1998_v34, %v2180_v21  ;;  %v868_v39 = vsel %vm2873_vm14, %v2203_v16, 128 }
 0x13c   :  { %v893_v3 = vsel %vm892_vm11, %v891_v9, %v848_v54  ;;  %vm962_vm12 = vcmp.lt.s32.totalorder %v961_v56, %v834_v27  ;;  %v838_v11 = vsel %vm2871_vm10, %v2137_v38, 128  ;;  %vm2872_vm11 = vcmp.eq.f32.partialorder %v2080_v6, %v2125_v45 }
 0x13d   :  { %vm894_vm7 = vcmp.lt.s32.totalorder %v893_v3, %v852_v57  ;;  %v963_v23 = vsel %vm962_vm12, %v961_v56, %v834_v27  ;;  %v864_v52 = vsel %vm2872_vm11, %v2200_v62, 128  ;;  %vm2877_vm12 = vcmp.eq.f32.partialorder %v2010_v55, %v2180_v21  ;;  %v2883_v56 = vld [vmem:[#allocation8_spill] sm:$0xff] }
 0x13e   :  { %v895_v54 = vsel %vm894_vm7, %v893_v3, %v852_v57  ;;  %vm964_vm3 = vcmp.lt.s32.totalorder %v963_v23, %v838_v11  ;;  %v2875_v57 = vld [vmem:[#allocation30_spill] sm:$0xff]  ;;  %v842_v27 = vsel %vm2877_vm12, %v2172_v2, 128  ;;  %vm2878_vm10 = vcmp.eq.f32.partialorder %v2022_v24, %v2180_v21 }
 0x13f   :  { %vm896_vm8 = vcmp.lt.s32.totalorder %v895_v54, %v856_v59  ;;  %vm2876_vm9 = vcmp.eq.f32.partialorder %v2875_v57, %v2125_v45  ;;  %v965_v6 = vsel %vm964_vm3, %v963_v23, %v838_v11  ;;  %v846_v43 = vsel %vm2878_vm10, %v2175_v28, 128  ;;  %v2885_v23 = vld [vmem:[#allocation10_spill] sm:$0xff] }
 0x140   :  { %v872_v12 = vsel %vm2876_vm9, %v2874_v37, 128  ;;  %v897_v34 = vsel %vm896_vm8, %v895_v54, %v856_v59  ;;  %vm966_vm14 = vcmp.lt.s32.totalorder %v965_v6, %v842_v27  ;;  %v854_v55 = vsel %vm790_vm15, %v2183_v19, 128 }
 0x141   :  { %vm898_vm7 = vcmp.lt.s32.totalorder %v897_v34, %v860_v42  ;;  %v858_v59 = vsel %vm794_vm5, %v2186_v26, 128  ;;  %v967_v31 = vsel %vm966_vm14, %v965_v6, %v842_v27  ;;  %v813_v24 = vsel %vm749_vm4, %v2117_v17, 128  ;;  %v2891_v6 = vld [vmem:[#allocation14_spill] sm:$0xff] }
 0x142   :  { %v899_v45 = vsel %vm898_vm7, %v897_v34, %v860_v42  ;;  %vm968_vm3 = vcmp.lt.s32.totalorder %v967_v31, %v846_v43  ;;  %vm2879_vm15 = vcmp.eq.f32.partialorder %v2082_v4, %v2180_v21  ;;  %v870_v58 = vsel %vm2881_vm2, %v2203_v16, 128  ;;  %v2884_v42 = vld [vmem:[#allocation9_spill] sm:$0xff]  ;;  %v2888_v34 = vld [vmem:[#allocation12_spill] sm:$0xff] }
 0x143   :  { %vm900_vm8 = vcmp.lt.s32.totalorder %v899_v45, %v864_v52  ;;  %v866_v48 = vsel %vm2879_vm15, %v2200_v62, 128  ;;  %v969_v9 = vsel %vm968_vm3, %v967_v31, %v846_v43  ;;  %v821_v63 = vsel %vm2882_vm6, %v2123_v7, 128 }
 0x144   :  { %v901_v40 = vsel %vm900_vm8, %v899_v45, %v864_v52  ;;  %vm970_vm4 = vcmp.lt.s32.totalorder %v969_v9, %v850_v14  ;;  %vm915_vm13 = vcmp.lt.s32.totalorder %v813_v24, %v817_v53  ;;  %vm751_vm11 = vcmp.eq.f32.partialorder %v2883_v56, %v2262_v1  ;;  %v2893_v45 = vld [vmem:[#allocation15_spill] sm:$0xff] }
 0x145   :  { %vm902_vm5 = vcmp.lt.s32.totalorder %v901_v40, %v868_v39  ;;  %v971_v3 = vsel %vm970_vm4, %v969_v9, %v850_v14  ;;  %v916_v4 = vsel %vm915_vm13, %v813_v24, %v817_v53  ;;  %vm755_vm7 = vcmp.eq.f32.partialorder %v2884_v42, %v2262_v1  ;;  %v2899_v53 = vld [vmem:[#allocation22_spill] sm:$0xff] }
 0x146   :  { %v903_v5 = vsel %vm902_vm5, %v901_v40, %v868_v39  ;;  %vm972_vm12 = vcmp.lt.s32.totalorder %v971_v3, %v854_v55  ;;  %vm917_vm10 = vcmp.lt.s32.totalorder %v916_v4, %v821_v63  ;;  %vm759_vm14 = vcmp.eq.f32.partialorder %v2885_v23, %v2262_v1  ;;  %v2887_v39 = vld [vmem:[#allocation11_spill] sm:$0xff] }
 0x147   :  { %vm904_vm9 = vcmp.lt.s32.totalorder %v903_v5, %v872_v12  ;;  %v973_v11 = vsel %vm972_vm12, %v971_v3, %v854_v55  ;;  %vm2886_vm3 = vcmp.eq.f32.partialorder %v1964_v32, %v2252_v0  ;;  %v918_v52 = vsel %vm917_vm10, %v916_v4, %v821_v63 }
 0x148   :  { %v905_v54 = vsel %vm904_vm9, %v903_v5, %v872_v12  ;;  %vm974_vm8 = vcmp.lt.s32.totalorder %v973_v11, %v858_v59  ;;  %v825_v15 = vsel %vm2886_vm3, %v2128_v33, 128  ;;  %vm763_vm15 = vcmp.eq.f32.partialorder %v2887_v39, %v2262_v1  ;;  %v2889_v12 = vld [vmem:[#allocation13_spill] sm:$0xff] }
 0x149   :  { %v975_v57 = vsel %vm974_vm8, %v973_v11, %v858_v59  ;;  %vm919_vm5 = vcmp.lt.s32.totalorder %v918_v52, %v825_v15  ;;  %vm767_vm2 = vcmp.eq.f32.partialorder %v2888_v34, %v2262_v1  ;;  %vm2890_vm13 = vcmp.eq.f32.partialorder %v1976_v49, %v2252_v0  ;;  %v2895_v59 = vld [vmem:[#allocation16_spill] sm:$0xff]  ;;  %v2903_v5 = vld [vmem:[#allocation29_spill] sm:$0xff] }
 0x14a   :  { %vm976_vm6 = vcmp.lt.s32.totalorder %v975_v57, %v862_v20  ;;  %v829_v27 = vsel %vm2890_vm13, %v2131_v36, 128  ;;  %v920_v32 = vsel %vm919_vm5, %v918_v52, %v825_v15  ;;  %vm2892_vm12 = vcmp.eq.f32.partialorder %v2106_v50, %v2180_v21  ;;  %v2896_v50 = vld [vmem:[#allocation18_spill] sm:$0xff]  ;;  %v2897_v21 = vld [vmem:[#allocation20_spill] sm:$0xff] }
 0x14b   :  { %v874_v43 = vsel %vm2892_vm12, %v2874_v37, 128  ;;  %v977_v14 = vsel %vm976_vm6, %v975_v57, %v862_v20  ;;  %vm921_vm10 = vcmp.lt.s32.totalorder %v920_v32, %v829_v27  ;;  %vm2894_vm4 = vcmp.eq.f32.partialorder %v1988_v10, %v2252_v0 }
 0x14c   :  { %vm978_vm3 = vcmp.lt.s32.totalorder %v977_v14, %v866_v48  ;;  %v833_v49 = vsel %vm2894_vm4, %v2134_v41, 128  ;;  %v922_v55 = vsel %vm921_vm10, %v920_v32, %v829_v27  ;;  %vm2898_vm8 = vcmp.eq.f32.partialorder %v2000_v35, %v2252_v0  ;;  %v2902_v35 = vld [vmem:[#allocation26_spill] sm:$0xff] }
 0x14d   :  { %v979_v31 = vsel %vm978_vm3, %v977_v14, %v866_v48  ;;  %vm923_vm13 = vcmp.lt.s32.totalorder %v922_v55, %v833_v49  ;;  %v837_v24 = vsel %vm2898_vm8, %v2137_v38, 128  ;;  %vm2900_vm10 = vcmp.eq.f32.partialorder %v2012_v60, %v2252_v0  ;;  %v2901_v48 = vld [vmem:[#allocation24_spill] sm:$0xff] }
 0x14e   :  { %vm980_vm9 = vcmp.lt.s32.totalorder %v979_v31, %v870_v58  ;;  %v924_v10 = vsel %vm923_vm13, %v922_v55, %v833_v49  ;;  %v841_v20 = vsel %vm2900_vm10, %v2172_v2, 128  ;;  %v906_v9 = vrot.slane %v905_v54, 4 }
 0x14f   :  { %v981_v40 = vsel %vm980_vm9, %v979_v31, %v870_v58  ;;  %vm925_vm3 = vcmp.lt.s32.totalorder %v924_v10, %v837_v24  ;;  %vm803_vm8 = vcmp.eq.f32.partialorder %v2902_v35, %v2262_v1  ;;  %vm807_vm9 = vcmp.eq.f32.partialorder %v2903_v5, %v2262_v1  ;;  %v2904_v58 = vld [vmem:[#allocation32_spill] sm:$0xff] }
 0x150   :  { %vm982_vm12 = vcmp.lt.s32.totalorder %v981_v40, %v874_v43  ;;  %v926_v61 = vsel %vm925_vm3, %v924_v10, %v837_v24  ;;  %vm2905_vm10 = vcmp.eq.f32.partialorder %v2024_v25, %v2252_v0  ;;  %vm907_vm5 = vcmp.lt.s32.totalorder %v905_v54, %v906_v9 }
 0x151   :  { %v983_v63 = vsel %vm982_vm12, %v981_v40, %v874_v43  ;;  %vm927_vm13 = vcmp.lt.s32.totalorder %v926_v61, %v841_v20  ;;  %v845_v60 = vsel %vm2905_vm10, %v2175_v28, 128  ;;  %vm2906_vm3 = vcmp.eq.f32.partialorder %v2863_v13, %v2252_v0 }
 0x152   :  { %v928_v3 = vsel %vm927_vm13, %v926_v61, %v841_v20  ;;  %v849_v4 = vsel %vm2906_vm3, %v2178_v22, 128  ;;  %v853_v15 = vsel %vm789_vm0, %v2183_v19, 128  ;;  %v908_v57 = vsel %vm907_vm5, %v905_v54, %v906_v9 }
 0x153   :  { %vm929_vm6 = vcmp.lt.s32.totalorder %v928_v3, %v845_v60  ;;  %v815_v25 = vsel %vm751_vm11, %v2117_v17, 128  ;;  %v819_v13 = vsel %vm755_vm7, %v2120_v51, 128  ;;  %v909_v32 = vrot.slane %v908_v57, 2 }
 0x154   :  { %v930_v11 = vsel %vm929_vm6, %v928_v3, %v845_v60  ;;  %vm2907_vm6 = vcmp.eq.f32.partialorder %v2865_v44, %v2252_v0  ;;  %v861_v54 = vsel %vm797_vm1, %v2197_v46, 128  ;;  %vm993_vm11 = vcmp.lt.s32.totalorder %v815_v25, %v819_v13 }
 0x155   :  { %vm931_vm12 = vcmp.lt.s32.totalorder %v930_v11, %v849_v4  ;;  %v857_v27 = vsel %vm2907_vm6, %v2186_v26, 128  ;;  %v823_v42 = vsel %vm759_vm14, %v2123_v7, 128  ;;  %v994_v43 = vsel %vm993_vm11, %v815_v25, %v819_v13 }
 0x156   :  { %v932_v52 = vsel %vm931_vm12, %v930_v11, %v849_v4  ;;  %vm2908_vm7 = vcmp.eq.f32.partialorder %v2867_v18, %v2252_v0  ;;  %v827_v47 = vsel %vm763_vm15, %v2128_v33, 128  ;;  %vm910_vm1 = vcmp.lt.s32.totalorder %v908_v57, %v909_v32 }
 0x157   :  { %vm933_vm4 = vcmp.lt.s32.totalorder %v932_v52, %v853_v15  ;;  %v865_v44 = vsel %vm2908_vm7, %v2200_v62, 128  ;;  %vm2909_vm14 = vcmp.eq.f32.partialorder %v2868_v8, %v2252_v0  ;;  %v984_v31 = vrot.slane %v983_v63, 4 }
 0x158   :  { %v934_v30 = vsel %vm933_vm4, %v932_v52, %v853_v15  ;;  %vm995_vm4 = vcmp.lt.s32.totalorder %v994_v43, %v823_v42  ;;  %v869_v23 = vsel %vm2909_vm14, %v2203_v16, 128  ;;  %v831_v18 = vsel %vm767_vm2, %v2131_v36, 128 }
 0x159   :  { %vm935_vm0 = vcmp.lt.s32.totalorder %v934_v30, %v857_v27  ;;  %v996_v49 = vsel %vm995_vm4, %v994_v43, %v823_v42  ;;  %vm2910_vm15 = vcmp.eq.f32.partialorder %v2869_v29, %v2252_v0  ;;  %v911_v40 = vsel %vm910_vm1, %v908_v57, %v909_v32 }
 0x15a   :  { %v936_v56 = vsel %vm935_vm0, %v934_v30, %v857_v27  ;;  %vm997_vm10 = vcmp.lt.s32.totalorder %v996_v49, %v827_v47  ;;  %v873_v39 = vsel %vm2910_vm15, %v2874_v37, 128  ;;  %vm2911_vm0 = vcmp.eq.f32.partialorder %v2889_v12, %v2262_v1 }
 0x15b   :  { %vm937_vm5 = vcmp.lt.s32.totalorder %v936_v56, %v861_v54  ;;  %v998_v24 = vsel %vm997_vm10, %v996_v49, %v827_v47  ;;  %v835_v8 = vsel %vm2911_vm0, %v2134_v41, 128  ;;  %vm2912_vm2 = vcmp.eq.f32.partialorder %v2891_v6, %v2262_v1 }
 0x15c   :  { %v938_v14 = vsel %vm937_vm5, %v936_v56, %v861_v54  ;;  %vm999_vm12 = vcmp.lt.s32.totalorder %v998_v24, %v831_v18  ;;  %vm985_vm5 = vcmp.lt.s32.totalorder %v983_v63, %v984_v31  ;;  %v839_v0 = vsel %vm2912_vm2, %v2137_v38, 128 }
 0x15d   :  { %vm939_vm13 = vcmp.lt.s32.totalorder %v938_v14, %v865_v44  ;;  %v1000_v20 = vsel %vm999_vm12, %v998_v24, %v831_v18  ;;  %v912_v61 = vrot.slane %v911_v40, 1  ;;  %v986_v3 = vsel %vm985_vm5, %v983_v63, %v984_v31 }
 0x15e   :  { %v940_v55 = vsel %vm939_vm13, %v938_v14, %v865_v44  ;;  %vm1001_vm11 = vcmp.lt.s32.totalorder %v1000_v20, %v835_v8  ;;  %vm2913_vm13 = vcmp.eq.f32.partialorder %v2893_v45, %v2262_v1  ;;  %vm2914_vm14 = vcmp.eq.f32.partialorder %v2895_v59, %v2262_v1 }
 0x15f   :  { %vm941_vm3 = vcmp.lt.s32.totalorder %v940_v55, %v869_v23  ;;  %v1002_v29 = vsel %vm1001_vm11, %v1000_v20, %v835_v8  ;;  %v843_v12 = vsel %vm2913_vm13, %v2172_v2, 128  ;;  %v847_v6 = vsel %vm2914_vm14, %v2175_v28, 128 }
 0x160   :  { %v942_v10 = vsel %vm941_vm3, %v940_v55, %v869_v23  ;;  %vm1003_vm7 = vcmp.lt.s32.totalorder %v1002_v29, %v839_v0  ;;  %vm913_vm10 = vcmp.lt.s32.totalorder %v911_v40, %v912_v61  ;;  %v987_v52 = vrot.slane %v986_v3, 2 }
 0x161   :  { %vm943_vm6 = vcmp.lt.s32.totalorder %v942_v10, %v873_v39  ;;  %v1004_v60 = vsel %vm1003_vm7, %v1002_v29, %v839_v0  ;;  %vm2915_vm12 = vcmp.eq.f32.partialorder %v2896_v50, %v2262_v1  ;;  %v2532_v25 = vsel %vm913_vm10, %v911_v40, %v912_v61 }
 0x162   :  { %v944_v9 = vsel %vm943_vm6, %v942_v10, %v873_v39  ;;  %vm1005_vm1 = vcmp.lt.s32.totalorder %v1004_v60, %v843_v12  ;;  %v851_v45 = vsel %vm2915_vm12, %v2178_v22, 128  ;;  %vm2916_vm0 = vcmp.eq.f32.partialorder %v2897_v21, %v2262_v1 }
 0x163   :  { %v945_v34 = vrot.slane %v944_v9, 4  ;;  %v1006_v15 = vsel %vm1005_vm1, %v1004_v60, %v843_v12  ;;  %v855_v59 = vsel %vm2916_vm0, %v2183_v19, 128  ;;  %vm2917_vm11 = vcmp.eq.f32.partialorder %v2899_v53, %v2262_v1 }
 0x164   :  { %vm1007_vm3 = vcmp.lt.s32.totalorder %v1006_v15, %v847_v6  ;;  %v859_v30 = vsel %vm2917_vm11, %v2186_v26, 128  ;;  %vm2542_vm2 = vcmp.lt.s32.totalorder %v986_v3, %v987_v52  ;;  %vm1032_vm1 = vcmp.eq.s32.totalorder %v2117_v17, %v2532_v25 }
 0x165   :  { %vm946_vm4 = vcmp.lt.s32.totalorder %v944_v9, %v945_v34  ;;  %v1008_v57 = vsel %vm1007_vm3, %v1006_v15, %v847_v6  ;;  %vm1036_vm14 = vcmp.eq.s32.totalorder %v2120_v51, %v2532_v25  ;;  %v1722_v42 = vmov 1.0|1.0  }
 0x166   :  { %v947_v4 = vsel %vm946_vm4, %v944_v9, %v945_v34  ;;  %vm1009_vm6 = vcmp.lt.s32.totalorder %v1008_v57, %v851_v45  ;;  %vm2920_vm4 = vcmp.eq.f32.partialorder %v2901_v48, %v2262_v1  ;;  %v867_v48 = vsel %vm803_vm8, %v2200_v62, 128  ;;  %vm1600_vm11 = vmpackc.low %vm1036_vm14, %vm1032_vm1  ;;  %v1224_v34 = vld [vmem:[%s2777_s2] sm:$0xf]  ;;  %s1724_s2 = smov [#allocation4]  }
 0x167   :  { %v948_v11 = vrot.slane %v947_v4, 2  ;;  %v1010_v27 = vsel %vm1009_vm6, %v1008_v57, %v851_v45  ;;  %v863_v32 = vsel %vm2920_vm4, %v2197_v46, 128  ;;  %v989_v43 = vsel %vm2542_vm2, %v986_v3, %v987_v52  ;;  %s1422_s8 = sshll.u32 %s1724_s2, 4  ;;  %s1423_s8 = int_to_ptr.vmem [resolvable:$true] %s1422_s8 }
 0x168   :  { %vm1011_vm5 = vcmp.lt.s32.totalorder %v1010_v27, %v855_v59  ;;  %vm1040_vm4 = vcmp.eq.s32.totalorder %v2123_v7, %v2532_v25  ;;  %v871_v35 = vsel %vm807_vm9, %v2203_v16, 128  ;;  %vm2921_vm14 = vcmp.eq.f32.partialorder %v2904_v58, %v2262_v1  ;;  %s1672_s9 = scalar_lea.vmem %s1423_s8, 64  ;;  %p1677_p1 = scmp.lt.s32.totalorder %s1423_s8, %s1423_s8 }
 0x169   :  { %vm949_vm15 = vcmp.lt.s32.totalorder %v947_v4, %v948_v11  ;;  %v1012_v54 = vsel %vm1011_vm5, %v1010_v27, %v855_v59  ;;  %v875_v47 = vsel %vm2921_vm14, %v2874_v37, 128  ;;  %v990_v49 = vrot.slane %v989_v43, 1  ;;  %p1673_p0 = scmp.ne.s32.totalorder %s1423_s8, %s1672_s9  ;;  %p1678_p2 = scmp.lt.s32.totalorder %s1672_s9, %s1672_s9 }
 0x16a   :  { %v950_v63 = vsel %vm949_vm15, %v947_v4, %v948_v11  ;;  %vm1013_vm13 = vcmp.lt.s32.totalorder %v1012_v54, %v859_v30  ;;  %v1723_v55 = vmov 1966171168  }
 0x16b   :  { %v951_v13 = vrot.slane %v950_v63, 1  ;;  %v1014_v53 = vsel %vm1013_vm13, %v1012_v54, %v859_v30  ;;  %vm1044_vm13 = vcmp.eq.s32.totalorder %v2128_v33, %v2532_v25  ;;  %v1380_v31 = vunpack.c.l.s4 %v1723_v55  ;;  %p1679_p3 = por %p1678_p2, %p1677_p1 }
 0x16c   :  { %vm1015_vm12 = vcmp.lt.s32.totalorder %v1014_v53, %v863_v32  ;;  %vm1604_vm9 = vmpackc.low %vm1044_vm13, %vm1040_vm4  ;;  %vm1056_vm13 = vcmp.eq.s32.totalorder %v2137_v38, %v2532_v25 }
 0x16d   :  { %vm952_vm7 = vcmp.lt.s32.totalorder %v950_v63, %v951_v13  ;;  %v1016_v56 = vsel %vm1015_vm12, %v1014_v53, %v863_v32  ;;  %vm1052_vm12 = vcmp.eq.s32.totalorder %v2134_v41, %v2532_v25  ;;  %v1381_v10 = vunpack.c.0.s8 %v1380_v31  ;;  %p1680_p4 = pnand %p1679_p3, %p1673_p0 }
 0x16e   :  { %v2550_v21 = vsel %vm952_vm7, %v950_v63, %v951_v13  ;;  %vm1017_vm5 = vcmp.lt.s32.totalorder %v1016_v56, %v867_v48 }
 0x16f   :  { %vm1033_vm10 = vcmp.eq.s32.totalorder %v2117_v17, %v2550_v21  ;;  %vm1037_vm3 = vcmp.eq.s32.totalorder %v2120_v51, %v2550_v21  ;;  %vm1041_vm15 = vcmp.eq.s32.totalorder %v2123_v7, %v2550_v21  ;;  %vm1045_vm0 = vcmp.eq.s32.totalorder %v2128_v33, %v2550_v21 }
 0x170   :  { %vm1598_vm6 = vmpackc.low %vm1037_vm3, %vm1033_vm10  ;;  %v1018_v44 = vsel %vm1017_vm5, %v1016_v56, %v867_v48  ;;  %vm1049_vm8 = vcmp.eq.s32.totalorder %v2131_v36, %v2550_v21  ;;  %vm1053_vm2 = vcmp.eq.s32.totalorder %v2134_v41, %v2550_v21  ;;  %v1377_v14 = vcombine.low %v2532_v25, %v2550_v21 }
 0x171   :  { %1599 = vmatprep.subr.msk.bf16.mxu0 %vm1598_vm6, %v1722_v42  ;;  %vm1602_vm7 = vmpackc.low %vm1045_vm0, %vm1041_vm15  ;;  %vm1019_vm1 = vcmp.lt.s32.totalorder %v1018_v44, %v871_v35  ;;  %vm1048_vm15 = vcmp.eq.s32.totalorder %v2131_v36, %v2532_v25  ;;  %vm1057_vm6 = vcmp.eq.s32.totalorder %v2137_v38, %v2550_v21  ;;  %vm1061_vm0 = vcmp.eq.s32.totalorder %v2172_v2, %v2550_v21 }
 0x172   :  { %1601 = vmatpush1.bf16.msk.msra.mxu0 %vm1600_vm11, %v1722_v42  ;;  %v1020_v5 = vsel %vm1019_vm1, %v1018_v44, %v871_v35  ;;  %vm1606_vm3 = vmpackc.low %vm1053_vm2, %vm1049_vm8  ;;  %vm991_vm5 = vcmp.lt.s32.totalorder %v989_v43, %v990_v49  ;;  %vm1060_vm8 = vcmp.eq.s32.totalorder %v2172_v2, %v2532_v25  ;;  %vm1065_vm2 = vcmp.eq.s32.totalorder %v2175_v28, %v2550_v21 }
 0x173   :  { %1603 = vmatprep.subr.msk.bf16.mxu0 %vm1602_vm7, %v1722_v42  ;;  %vm1021_vm10 = vcmp.lt.s32.totalorder %v1020_v5, %v875_v47  ;;  %vm1608_vm11 = vmpackc.low %vm1052_vm12, %vm1048_vm15  ;;  %vm1069_vm1 = vcmp.eq.s32.totalorder %v2178_v22, %v2550_v21  ;;  %v2611_v24 = vsel %vm991_vm5, %v989_v43, %v990_v49  ;;  %vm1068_vm15 = vcmp.eq.s32.totalorder %v2178_v22, %v2532_v25 }
 0x174   :  { %v1022_v23 = vsel %vm1021_vm10, %v1020_v5, %v875_v47  ;;  %vm1610_vm4 = vmpackc.low %vm1061_vm0, %vm1057_vm6  ;;  %vm1073_vm12 = vcmp.eq.s32.totalorder %v2183_v19, %v2550_v21  ;;  %vm1077_vm6 = vcmp.eq.s32.totalorder %v2186_v26, %v2550_v21  ;;  %vm1034_vm0 = vcmp.eq.s32.totalorder %v2117_v17, %v2611_v24 }
 0x175   :  { %v1023_v1 = vrot.slane %v1022_v23, 4  ;;  %vm1612_vm14 = vmpackc.low %vm1060_vm8, %vm1056_vm13  ;;  %v1384_v9 = vsub.s32 %v1381_v10, %v2117_v17 }
 0x176   :  { %1605 = vmatpush1.bf16.msk.msra.mxu0 %vm1604_vm9, %v1722_v42  ;;  %vm1614_vm10 = vmpackc.low %vm1069_vm1, %vm1065_vm2  ;;  %vm1081_vm1 = vcmp.eq.s32.totalorder %v2197_v46, %v2550_v21 }
 0x177   :  { %1607 = vmatprep.subr.msk.bf16.mxu0 %vm1606_vm3, %v1722_v42  ;;  %vm1024_vm7 = vcmp.lt.s32.totalorder %v1022_v23, %v1023_v1  ;;  %vm1064_vm3 = vcmp.eq.s32.totalorder %v2175_v28, %v2532_v25  ;;  %vm1618_vm8 = vmpackc.low %vm1077_vm6, %vm1073_vm12 }
 0x178   :  { %v1025_v58 = vsel %vm1024_vm7, %v1022_v23, %v1023_v1  ;;  %vm1616_vm5 = vmpackc.low %vm1068_vm15, %vm1064_vm3  ;;  %vm1072_vm7 = vcmp.eq.s32.totalorder %v2183_v19, %v2532_v25 }
 0x179   :  { %v1026_v18 = vrot.slane %v1025_v58, 2 }
 0x17a   :  { %1609 = vmatpush1.bf16.msk.msra.mxu0 %vm1608_vm11, %v1722_v42  ;;  %vm1038_vm11 = vcmp.eq.s32.totalorder %v2120_v51, %v2611_v24 }
 0x17b   :  { %1611 = vmatprep.subr.msk.bf16.mxu0 %vm1610_vm4, %v1722_v42  ;;  %vm1027_vm9 = vcmp.lt.s32.totalorder %v1025_v58, %v1026_v18  ;;  %vm1076_vm4 = vcmp.eq.s32.totalorder %v2186_v26, %v2532_v25  ;;  %vm2634_vm2 = vmpackc.low %vm1038_vm11, %vm1034_vm0  ;;  %vm1042_vm0 = vcmp.eq.s32.totalorder %v2123_v7, %v2611_v24  ;;  %vm1046_vm11 = vcmp.eq.s32.totalorder %v2128_v33, %v2611_v24 }
 0x17c   :  { %v1028_v39 = vsel %vm1027_vm9, %v1025_v58, %v1026_v18  ;;  %vm1620_vm12 = vmpackc.low %vm1076_vm4, %vm1072_vm7  ;;  %vm1089_vm4 = vcmp.eq.s32.totalorder %v2203_v16, %v2550_v21 }
 0x17d   :  { %v1029_v40 = vrot.slane %v1028_v39, 1 }
 0x17e   :  { %1613 = vmatpush1.bf16.msk.msra.mxu0 %vm1612_vm14, %v1722_v42  ;;  %vm1085_vm14 = vcmp.eq.s32.totalorder %v2200_v62, %v2550_v21 }
 0x17f   :  { %1615 = vmatprep.subr.msk.bf16.mxu0 %vm1614_vm10, %v1722_v42  ;;  %vm1030_vm13 = vcmp.lt.s32.totalorder %v1028_v39, %v1029_v40 }
 0x180   :  { %v2632_v8 = vsel %vm1030_vm13, %v1028_v39, %v1029_v40  ;;  %vm1080_vm13 = vcmp.eq.s32.totalorder %v2197_v46, %v2532_v25 }
 0x181   :  { %vm1035_vm9 = vcmp.eq.s32.totalorder %v2117_v17, %v2632_v8  ;;  %vm1039_vm10 = vcmp.eq.s32.totalorder %v2120_v51, %v2632_v8  ;;  %vm1043_vm3 = vcmp.eq.s32.totalorder %v2123_v7, %v2632_v8  ;;  %vm1047_vm15 = vcmp.eq.s32.totalorder %v2128_v33, %v2632_v8 }
 0x182   :  { %1617 = vmatpush1.bf16.msk.msra.mxu0 %vm1616_vm5, %v1722_v42  ;;  %vm1630_vm6 = vmpackc.low %vm1039_vm10, %vm1035_vm9  ;;  %vm1093_vm9 = vcmp.eq.s32.totalorder %v2874_v37, %v2550_v21  ;;  %v1385_v7 = vrot.slane %v1377_v14, %v1384_v9  ;;  %v1378_v17 = vcombine.low %v2611_v24, %v2632_v8 }
 0x183   :  { %1619 = vmatprep.subr.msk.bf16.mxu0 %vm1618_vm8, %v1722_v42  ;;  %1631 = vmatprep.subr.msk.bf16.mxu1 %vm1630_vm6, %v1722_v42  ;;  %vm1622_vm5 = vmpackc.low %vm1085_vm14, %vm1081_vm1  ;;  %vm1084_vm8 = vcmp.eq.s32.totalorder %v2200_v62, %v2532_v25  ;;  %vm1051_vm14 = vcmp.eq.s32.totalorder %v2131_v36, %v2632_v8 }
 0x184   :  { %1633 = vmatpush1.bf16.msk.msra.mxu1 %vm2634_vm2, %v1722_v42  ;;  %vm1634_vm7 = vmpackc.low %vm1047_vm15, %vm1043_vm3  ;;  %vm1055_vm2 = vcmp.eq.s32.totalorder %v2134_v41, %v2632_v8  ;;  %vm1050_vm3 = vcmp.eq.s32.totalorder %v2131_v36, %v2611_v24  ;;  %vm1054_vm15 = vcmp.eq.s32.totalorder %v2134_v41, %v2611_v24  ;;  %v1392_v51 = vrot.slane %v1378_v17, %v1384_v9 }
 0x185   :  { %1635 = vmatprep.subr.msk.bf16.mxu1 %vm1634_vm7, %v1722_v42  ;;  %vm1636_vm1 = vmpackc.low %vm1046_vm11, %vm1042_vm0  ;;  %vm1088_vm0 = vcmp.eq.s32.totalorder %v2203_v16, %v2532_v25  ;;  %vm1092_vm11 = vcmp.eq.s32.totalorder %v2874_v37, %v2532_v25  ;;  %v2924_v36 = vlaneseq }
 0x186   :  { %1621 = vmatpush1.bf16.msk.msra.mxu0 %vm1620_vm12, %v1722_v42  ;;  %vm1624_vm10 = vmpackc.low %vm1084_vm8, %vm1080_vm13  ;;  %vm1063_vm13 = vcmp.eq.s32.totalorder %v2172_v2, %v2632_v8  ;;  %v1393_v33 = vcombine.low %v1385_v7, %v1392_v51 }
 0x187   :  { %1623 = vmatprep.subr.msk.bf16.mxu0 %vm1622_vm5, %v1722_v42  ;;  %vm1626_vm12 = vmpackc.low %vm1093_vm9, %vm1089_vm4  ;;  %vm1059_vm5 = vcmp.eq.s32.totalorder %v2137_v38, %v2632_v8  ;;  %vm1403_vm7 = vcmp.lt.s32.totalorder %v2924_v36, 512 }
 0x188   :  { %1637 = vmatpush1.bf16.msk.msra.mxu1 %vm1636_vm1, %v1722_v42  ;;  %vm1638_vm6 = vmpackc.low %vm1055_vm2, %vm1051_vm14  ;;  %v1400_v41 = vrot.slane %v1393_v33, %v1384_v9  ;;  %vm1058_vm1 = vcmp.eq.s32.totalorder %v2137_v38, %v2611_v24  ;;  %vm1062_vm14 = vcmp.eq.s32.totalorder %v2172_v2, %v2611_v24  ;;  %vm1067_vm2 = vcmp.eq.s32.totalorder %v2175_v28, %v2632_v8 }
 0x189   :  { %1639 = vmatprep.subr.msk.bf16.mxu1 %vm1638_vm6, %v1722_v42  ;;  %vm1640_vm8 = vmpackc.low %vm1054_vm15, %vm1050_vm3  ;;  %vm1070_vm6 = vcmp.eq.s32.totalorder %v2178_v22, %v2611_v24 }
 0x18a   :  { %1625 = vmatpush1.bf16.msk.msra.mxu0 %vm1624_vm10, %v1722_v42  ;;  %vm1628_vm4 = vmpackc.low %vm1092_vm11, %vm1088_vm0  ;;  %vm1071_vm10 = vcmp.eq.s32.totalorder %v2178_v22, %v2632_v8  ;;  %1405 = vst.msk [vmem:[#allocation4] sm:$0xf] %vm1403_vm7, %v1400_v41  ;;  %vm1075_vm0 = vcmp.eq.s32.totalorder %v2183_v19, %v2632_v8  ;;  %vm1079_vm11 = vcmp.eq.s32.totalorder %v2186_v26, %v2632_v8 }
 0x18b   :  { %1627 = vmatprep.subr.msk.bf16.mxu0 %vm1626_vm12, %v1722_v42  ;;  %vm1642_vm9 = vmpackc.low %vm1063_vm13, %vm1059_vm5  ;;  %vm1066_vm12 = vcmp.eq.s32.totalorder %v2175_v28, %v2611_v24  ;;  %vm1078_vm7 = vcmp.eq.s32.totalorder %v2186_v26, %v2611_v24 }
 0x18c   :  { %1641 = vmatpush1.bf16.msk.msra.mxu1 %vm1640_vm8, %v1722_v42  ;;  %vm1644_vm3 = vmpackc.low %vm1062_vm14, %vm1058_vm1  ;;  %vm1074_vm8 = vcmp.eq.s32.totalorder %v2183_v19, %v2611_v24 }
 0x18d   :  { %1643 = vmatprep.subr.msk.bf16.mxu1 %vm1642_vm9, %v1722_v42  ;;  %vm1646_vm15 = vmpackc.low %vm1071_vm10, %vm1067_vm2  ;;  %vm1087_vm9 = vcmp.eq.s32.totalorder %v2200_v62, %v2632_v8  ;;  %vm1082_vm2 = vcmp.eq.s32.totalorder %v2197_v46, %v2611_v24  ;;  %vm1086_vm10 = vcmp.eq.s32.totalorder %v2200_v62, %v2611_v24 }
 0x18e   :  { %1629 = vmatpush1.bf16.msk.msra.mxu0 %vm1628_vm4, %v1722_v42  ;;  %vm1648_vm5 = vmpackc.low %vm1070_vm6, %vm1066_vm12  ;;  %vm1083_vm4 = vcmp.eq.s32.totalorder %v2197_v46, %v2632_v8 }
 0x18f   :  { %vm1650_vm13 = vmpackc.low %vm1079_vm11, %vm1075_vm0  ;;  %vm1090_vm0 = vcmp.eq.s32.totalorder %v2203_v16, %v2611_v24  ;;  %vm1094_vm11 = vcmp.eq.s32.totalorder %v2874_v37, %v2611_v24 }
 0x190   :  { %1645 = vmatpush1.bf16.msk.msra.mxu1 %vm1644_vm3, %v1722_v42  ;;  %vm1652_vm1 = vmpackc.low %vm1078_vm7, %vm1074_vm8  ;;  %vm1091_vm3 = vcmp.eq.s32.totalorder %v2203_v16, %v2632_v8 }
 0x191   :  { %1290 = vmatmul.mubr.f32.vlgmr.msra.gmra.mrb[32].mxu0 %v1224_v34  ;;  %1647 = vmatprep.subr.msk.bf16.mxu1 %vm1646_vm15, %v1722_v42  ;;  %vm1654_vm14 = vmpackc.low %vm1087_vm9, %vm1083_vm4  ;;  %vm1095_vm15 = vcmp.eq.s32.totalorder %v2874_v37, %v2632_v8 }
 0x192   :  { %vm1656_vm12 = vmpackc.low %vm1086_vm10, %vm1082_vm2 }
 0x193   :  { %vm1658_vm6 = vmpackc.low %vm1095_vm15, %vm1091_vm3 }
 0x194   :  { %1649 = vmatpush1.bf16.msk.msra.mxu1 %vm1648_vm5, %v1722_v42  ;;  %vm1660_vm5 = vmpackc.low %vm1094_vm11, %vm1090_vm0 }
 0x195   :  { %1651 = vmatprep.subr.msk.bf16.mxu1 %vm1650_vm13, %v1722_v42 }
 0x198   :  { %1653 = vmatpush1.bf16.msk.msra.mxu1 %vm1652_vm1, %v1722_v42 }
 0x199   :  { %1655 = vmatprep.subr.msk.bf16.mxu1 %vm1654_vm14, %v1722_v42 }
 0x19c   :  { %1657 = vmatpush1.bf16.msk.msra.mxu1 %vm1656_vm12, %v1722_v42 }
 0x19d   :  { %1659 = vmatprep.subr.msk.bf16.mxu1 %vm1658_vm6, %v1722_v42 }
 0x1a0   :  { %1661 = vmatpush1.bf16.msk.msra.mxu1 %vm1660_vm5, %v1722_v42 }
 0x1a3   :  { %1361 = vmatmul.mubr.f32.vlgmr.msra.gmra.mrb[32].mxu1 %v1224_v34 }
 0x1a4   :  { %1683 = shalt.err (!%p1680_p4)
}
 0x1a5   :  { %s1684_s12 = scalar_lea.hbm %s2780_s5, 64 }
 0x1a6   :  { %p1685_p5 = scmp.ne.s32.totalorder %s2780_s5, %s1684_s12  ;;  %p1688_p6 = scmp.lt.u32.totalorder %s1684_s12, %s2780_s5 }
 0x1a8   :  { %p1690_p7 = pnand %p1688_p6, %p1685_p5 }
 0x1aa   :  { %1693 = shalt.err (!%p1690_p7)
}
 0x1ab   :  { %1425 = dma.vmem_to_hbm [thread:$0]  %s1423_s8, 64, %s2780_s5, [#allocation5]  }
 0x1ac   :  { %s1725_s19 = smov [#allocation2]  }
 0x1ad   :  { %s1412_s3 = sshll.u32 %s1725_s19, 4  ;;  %s1413_s3 = int_to_ptr.vmem [resolvable:$true] %s1412_s3 }
 0x1ae   :  { %s1694_s20 = scalar_lea.vmem %s1413_s3, 256  ;;  %p1699_p9 = scmp.lt.s32.totalorder %s1413_s3, %s1413_s3 }
 0x1af   :  { %p1695_p8 = scmp.ne.s32.totalorder %s1413_s3, %s1694_s20  ;;  %p1700_p10 = scmp.lt.s32.totalorder %s1694_s20, %s1694_s20 }
 0x1b1   :  { %p1701_p11 = por %p1700_p10, %p1699_p9 }
 0x1b3   :  { %p1702_p12 = pnand %p1701_p11, %p1695_p8 }
 0x264   :  { %v1291_v38 = vpop.f32.mrb[32].mxu0 }
 0x265   :  { %v1293_v2 = vpop.f32.mrb[33].mxu0 }
 0x266   :  { %v1371_v28 = vcombine.low %v1291_v38, %v1293_v2 }
 0x268   :  { %1375 = vst [vmem:[#allocation2] sm:$0xff] %v1371_v28 }
 0x276   :  { %v1362_v22 = vpop.f32.mrb[32].mxu1 }
 0x277   :  { %v1364_v19 = vpop.f32.mrb[33].mxu1 }
 0x278   :  { %v1372_v26 = vcombine.low %v1362_v22, %v1364_v19 }
 0x27a   :  { %1376 = vst [vmem:[#allocation2 + $0x8] sm:$0xff] %v1372_v26 }
 0x27b   :  { %1705 = shalt.err (!%p1702_p12)
}
 0x27c   :  { %s1706_s22 = scalar_lea.hbm %s2779_s4, 256 }
 0x27d   :  { %p1707_p13 = scmp.ne.s32.totalorder %s2779_s4, %s1706_s22  ;;  %p1710_p0 = scmp.lt.u32.totalorder %s1706_s22, %s2779_s4 }
 0x27f   :  { %p1712_p1 = pnand %p1710_p0, %p1707_p13 }
 0x281   :  { %1715 = shalt.err (!%p1712_p1)
}
 0x282   :  { %1415 = dma.vmem_to_hbm [thread:$0]  %s1413_s3, 256, %s2779_s4, [#allocation3]  }
 0x283   :  { %1716 = dma.done.wait [#allocation3], 256  }
 0x284   :  { %1717 = vsyncadd [#allocation3], 4294967040 }
 0x285   :  { %1718 = dma.done.wait [#allocation5], 64  }
 0x286   :  { %1719 = vsyncadd [#allocation5], 4294967232 }
 0x287   :  { %1432 = vsyncpa [#allocation3], 1 }
 0x288   :  { %1433 = vsyncpa [#allocation5], 1 }

</bundles_post_ra>
